<compile_context>
chip_gen: v7x
topology: tpu7x:2x2x1
jax: 0.10.0
libtpu: 0.0.40
codegen_flags: <defaults>
</compile_context>

<pallas_src>
import functools

import numpy as np
import jax
import jax.numpy as jnp
from jax.experimental import pallas as pl
from jax.experimental.pallas import tpu as pltpu


# ----------------------------------------------------------------------------
# Fused Pallas kernel: whole Decoder forward, one batch element per grid step
# ----------------------------------------------------------------------------

def _decoder_fused_kernel(
    x_ref, enc_ref, mask_ref, pe_ref, emb_w_ref, emb_b_ref,
    wqkv1_ref, wu1_ref, bu1_ref,
    wq2_ref, wkv2_ref, wu2_ref, bu2_ref,
    ffw1_ref, ffb1_ref, ffw2_ref, ffb2_ref, ln_ref,
    o_ref,
    *, n_layers, seq, seq_enc, heads, d_model, scale,
):
    f32 = jnp.float32

    def layer_norm(z, g, b):
        # LayerNorm over the last axis, eps = 1e-5 (PyTorch default).
        mu = jnp.mean(z, axis=-1, keepdims=True)
        var = jnp.mean(jnp.square(z - mu), axis=-1, keepdims=True)
        return (z - mu) * jax.lax.rsqrt(var + 1e-5) * g + b

    # ---- loop-invariant loads, hoisted once per grid step -------------------
    # Additive mask bias (0 where kept, -1e9 where masked); identical to
    # masked_fill(-1e9) after softmax since exp underflows to 0 either way.
    mask_bias = jnp.where(mask_ref[...] != 0.0, 0.0, -1e9).astype(f32)
    enc = enc_ref[...]                                        # (S_enc, D)
    enc_kv = jnp.broadcast_to(enc, (2 * heads, seq_enc, d_model))

    def attend(q, k, v, wu, bu, masked):
        # q: (H, Sq, D)   k, v: (H, Sk, D)   wu: (H, D, D)   bu: (1, D)
        # NOTE: the reference applies NO 1/sqrt(d) score scaling.
        s = jnp.einsum('hqd,hkd->hqk', q, k, preferred_element_type=f32)
        if masked:
            s = s + mask_bias                                 # bcast over heads
        m = jnp.max(s, axis=-1, keepdims=True)
        p = jnp.exp(s - m)
        p = p / jnp.sum(p, axis=-1, keepdims=True)            # exact softmax
        o = jnp.einsum('hqk,hkd->hqd', p, v, preferred_element_type=f32)
        # unify-heads folded in: concat_h(o_h) @ Wu == sum_h (o_h @ Wu_h)
        part = jnp.einsum('hqd,hde->hqe', o, wu, preferred_element_type=f32)
        return jnp.sum(part, axis=0) + bu                     # (Sq, D)

    # ---- embedding (Linear) + positional encoding; dropout == identity ------
    x = jnp.dot(x_ref[...], emb_w_ref[...],
                preferred_element_type=f32) + emb_b_ref[...]
    x = x * scale + pe_ref[...]                               # (S, D)

    # ---- N decoder layers (statically unrolled) ------------------------------
    for i in range(n_layers):
        ln_i = ln_ref[i]                                      # (6, D)

        # masked self-attention: Q|K|V head blocks stacked on the LEADING axis
        xb = jnp.broadcast_to(x, (3 * heads, seq, d_model))
        qkv = jnp.einsum('hsd,hde->hse', xb, wqkv1_ref[i],
                         preferred_element_type=f32)          # (3H, S, D)
        a1 = attend(qkv[:heads], qkv[heads:2 * heads], qkv[2 * heads:],
                    wu1_ref[i], bu1_ref[i], masked=True)
        x = layer_norm(x + a1, ln_i[0:1, :], ln_i[1:2, :])

        # cross-attention over encoder output (no mask)
        xq = jnp.broadcast_to(x, (heads, seq, d_model))
        q2 = jnp.einsum('hsd,hde->hse', xq, wq2_ref[i],
                        preferred_element_type=f32)           # (H, S, D)
        kv2 = jnp.einsum('hsd,hde->hse', enc_kv, wkv2_ref[i],
                         preferred_element_type=f32)          # (2H, S_enc, D)
        a2 = attend(q2, kv2[:heads], kv2[heads:],
                    wu2_ref[i], bu2_ref[i], masked=False)
        x = layer_norm(x + a2, ln_i[2:3, :], ln_i[3:4, :])

        # feed-forward (Linear -> ReLU -> [dropout = id] -> Linear)
        h1 = jnp.dot(x, ffw1_ref[i], preferred_element_type=f32) + ffb1_ref[i]
        h1 = jnp.maximum(h1, 0.0)
        f = jnp.dot(h1, ffw2_ref[i], preferred_element_type=f32) + ffb2_ref[i]
        x = layer_norm(x + f, ln_i[4:5, :], ln_i[5:6, :])

    o_ref[...] = x


# ----------------------------------------------------------------------------
# Wrapper
# ----------------------------------------------------------------------------

def decoder_forward(params, x, enc_out, mask, *, heads, d_model):
    B, S, inp_dim = x.shape
    S_enc = enc_out.shape[1]
    N = params["wqkv1"].shape[0]
    dff = params["ffw1"].shape[-1]

    mask01 = (jnp.ones((S, S), jnp.float32) if mask is None
              else mask.astype(jnp.float32).reshape(S, S))
    pe = params["pe"][:S]                                     # (S, D)

    kern = functools.partial(
        _decoder_fused_kernel,
        n_layers=N, seq=S, seq_enc=S_enc, heads=heads, d_model=d_model,
        scale=float(np.sqrt(float(d_model))),
    )

    def _full_spec(arr):
        zeros = (0,) * arr.ndim
        return pl.BlockSpec(arr.shape, lambda b: zeros)

    weights = (
        params["emb_w"], params["emb_b"],
        params["wqkv1"], params["wu1"], params["bu1"],
        params["wq2"], params["wkv2"], params["wu2"], params["bu2"],
        params["ffw1"], params["ffb1"], params["ffw2"], params["ffb2"],
        params["ln"],
    )

    # Advisory cost estimate for the whole call.
    H, D = heads, d_model
    attn_flops = (2 * 3 * H * S * D * D          # self q/k/v projections
                  + 2 * 2 * H * S * S * D        # self scores + PV
                  + 2 * H * S * D * D            # self unify-heads
                  + 2 * H * S * D * D            # cross q projection
                  + 2 * 2 * H * S_enc * D * D    # cross k/v projections
                  + 2 * 2 * H * S * S_enc * D    # cross scores + PV
                  + 2 * H * S * D * D)           # cross unify-heads
    ffn_flops = 2 * 2 * S * D * dff
    flops = B * (2 * S * inp_dim * D + N * (attn_flops + ffn_flops))
    transcendentals = B * N * H * S * (S + S_enc)
    bytes_accessed = int(4 * (sum(int(a.size) for a in weights)
                              + B * S * inp_dim + B * S_enc * D
                              + S * S + S * D + B * S * D))

    out = pl.pallas_call(
        kern,
        grid=(B,),
        out_shape=jax.ShapeDtypeStruct((B * S, d_model), jnp.float32),
        in_specs=[
            pl.BlockSpec((S, inp_dim), lambda b: (b, 0)),      # x, per batch
            pl.BlockSpec((S_enc, d_model), lambda b: (b, 0)),  # enc, per batch
            _full_spec(mask01),
            _full_spec(pe),
        ] + [_full_spec(w) for w in weights],
        out_specs=pl.BlockSpec((S, d_model), lambda b: (b, 0)),
        compiler_params=pltpu.CompilerParams(
            dimension_semantics=("parallel",)),
        cost_estimate=pl.CostEstimate(
            flops=int(flops), transcendentals=int(transcendentals),
            bytes_accessed=bytes_accessed),
    )(
        x.reshape(B * S, inp_dim),
        enc_out.reshape(B * S_enc, d_model),
        mask01, pe, *weights,
    )
    return out.reshape(B, S, d_model)


# ----------------------------------------------------------------------------
# Parameter setup (matches the PyTorch module's structure)
# ----------------------------------------------------------------------------

def make_pe_table(window, d_model):
    # Matches the PyTorch double loop exactly (including the cos exponent).
    pe = np.zeros((window, d_model), np.float32)
    for pos in range(window):
        for i in range(0, d_model, 2):
            pe[pos, i] = np.sin(pos / 10000 ** (2 * i / d_model))
        for i in range(1, d_model, 2):
            pe[pos, i] = np.cos(pos / 10000 ** (2 * (i + 1) / d_model))
    return jnp.asarray(pe)


def init_decoder_params(key, N, pe_window, heads, inp_dim, d_model, dff):
    ks = jax.random.split(key, 13)
    w = lambda k, *s: jax.random.normal(k, s, jnp.float32) * 0.02
    # One decoder layer; get_clones() deepcopies it, so all N layers share
    # identical initial weights -> stack N copies along a leading axis.
    # Attention projection weights are stored head-major on the LEADING axis:
    # wqkv1 = [Q heads | K heads | V heads], wkv2 = [K heads | V heads],
    # wu* = per-head (D, D) blocks of the unify-heads Linear.
    layer = {
        "wqkv1": w(ks[0], 3 * heads, d_model, d_model),
        "wu1":   w(ks[1], heads, d_model, d_model),
        "bu1":   w(ks[2], 1, d_model),
        "wq2":   w(ks[3], heads, d_model, d_model),
        "wkv2":  w(ks[4], 2 * heads, d_model, d_model),
        "wu2":   w(ks[5], heads, d_model, d_model),
        "bu2":   w(ks[6], 1, d_model),
        "ffw1":  w(ks[7], d_model, dff),
        "ffb1":  w(ks[8], 1, dff),
        "ffw2":  w(ks[9], dff, d_model),
        "ffb2":  w(ks[10], 1, d_model),
        "ln": jnp.concatenate(
            [jnp.ones((1, d_model), jnp.float32),
             jnp.zeros((1, d_model), jnp.float32)] * 3, axis=0),  # (6, D)
    }
    params = {k: jnp.stack([v] * N, axis=0) for k, v in layer.items()}
    params["emb_w"] = w(ks[11], inp_dim, d_model)
    params["emb_b"] = w(ks[12], 1, d_model)
    params["pe"] = make_pe_table(pe_window, d_model)
    return params


# ----------------------------------------------------------------------------
# Pure-JAX reference (mirrors the PyTorch module, inference / no dropout)
# ----------------------------------------------------------------------------

def decoder_reference(params, x, enc_out, mask, *, heads, d_model):
    B, S, _ = x.shape
    N = params["wqkv1"].shape[0]

    def layer_norm(z, g, b):
        mu = jnp.mean(z, axis=-1, keepdims=True)
        var = jnp.mean(jnp.square(z - mu), axis=-1, keepdims=True)
        return (z - mu) * jax.lax.rsqrt(var + 1e-5) * g + b

    def attend(q, k, v, wu, bu, msk):
        s = jnp.einsum('bhqd,bhkd->bhqk', q, k)
        if msk is not None:
            s = jnp.where(msk != 0, s, -1e9)
        p = jax.nn.softmax(s, axis=-1)
        o = jnp.einsum('bhqk,bhkd->bhqd', p, v)
        return jnp.einsum('bhqd,hde->bqe', o, wu) + bu[0]

    h = jnp.einsum('bsi,id->bsd', x, params["emb_w"]) + params["emb_b"][0]
    h = h * jnp.sqrt(jnp.float32(d_model)) + params["pe"][:S]
    for i in range(N):
        ln = params["ln"][i]
        wqkv = params["wqkv1"][i]
        q = jnp.einsum('bsd,hde->bhse', h, wqkv[:heads])
        k = jnp.einsum('bsd,hde->bhse', h, wqkv[heads:2 * heads])
        v = jnp.einsum('bsd,hde->bhse', h, wqkv[2 * heads:])
        h = layer_norm(h + attend(q, k, v, params["wu1"][i], params["bu1"][i], mask),
                       ln[0], ln[1])
        q2 = jnp.einsum('bsd,hde->bhse', h, params["wq2"][i])
        wkv = params["wkv2"][i]
        k2 = jnp.einsum('bsd,hde->bhse', enc_out, wkv[:heads])
        v2 = jnp.einsum('bsd,hde->bhse', enc_out, wkv[heads:])
        h = layer_norm(h + attend(q2, k2, v2, params["wu2"][i], params["bu2"][i], None),
                       ln[2], ln[3])
        f = jnp.maximum(jnp.einsum('bsd,df->bsf', h, params["ffw1"][i])
                        + params["ffb1"][i][0], 0.0)
        f = jnp.einsum('bsf,fd->bsd', f, params["ffw2"][i]) + params["ffb2"][i][0]
        h = layer_norm(h + f, ln[4], ln[5])
    return h


# TODO(synk): nn.Dropout layers are treated as inference-mode identity (no RNG drop mask).

if __name__ == "__main__":
    # Decoder(N=2, pe_window=16, heads=2, inp_dim=4, d_model=32, dff=64)
    B, S, S_enc = 2, 8, 8
    N_layers, pe_window, heads, inp_dim, d_model, dff = 2, 16, 2, 4, 32, 64

    key = jax.random.PRNGKey(0)
    kx, ke, kp = jax.random.split(key, 3)
    x = jax.random.normal(kx, (B, S, inp_dim), jnp.float32)
    enc_out = jax.random.normal(ke, (B, S_enc, d_model), jnp.float32)
    mask = jnp.tril(jnp.ones((S, S), jnp.float32))   # causal self-attention mask

    params = init_decoder_params(kp, N_layers, pe_window, heads, inp_dim, d_model, dff)

    fwd = jax.jit(functools.partial(decoder_forward, heads=heads, d_model=d_model))
    out = jax.block_until_ready(fwd(params, x, enc_out, mask))
    assert out.shape == (B, S, d_model), out.shape

    # Sanity check vs. pure-JAX reference (loose tol to absorb MXU f32 passes).
    ref = jax.block_until_ready(
        decoder_reference(params, x, enc_out, mask, heads=heads, d_model=d_model))
    np.testing.assert_allclose(np.asarray(out), np.asarray(ref), rtol=2e-2, atol=2e-2)

    print("KERNEL_OK")
</pallas_src>

<mosaic_0001>
module attributes {stable_mosaic.version = 11 : i64} {
  func.func @_decoder_fused_kernel(%arg0: i32, %arg1: memref<8x4xf32, #tpu.memory_space<vmem>>, %arg2: memref<8x32xf32, #tpu.memory_space<vmem>>, %arg3: memref<8x8xf32, #tpu.memory_space<vmem>>, %arg4: memref<8x32xf32, #tpu.memory_space<vmem>>, %arg5: memref<4x32xf32, #tpu.memory_space<vmem>>, %arg6: memref<1x32xf32, #tpu.memory_space<vmem>>, %arg7: memref<2x6x32x32xf32, #tpu.memory_space<vmem>>, %arg8: memref<2x2x32x32xf32, #tpu.memory_space<vmem>>, %arg9: memref<2x1x32xf32, #tpu.memory_space<vmem>>, %arg10: memref<2x2x32x32xf32, #tpu.memory_space<vmem>>, %arg11: memref<2x4x32x32xf32, #tpu.memory_space<vmem>>, %arg12: memref<2x2x32x32xf32, #tpu.memory_space<vmem>>, %arg13: memref<2x1x32xf32, #tpu.memory_space<vmem>>, %arg14: memref<2x32x64xf32, #tpu.memory_space<vmem>>, %arg15: memref<2x1x64xf32, #tpu.memory_space<vmem>>, %arg16: memref<2x64x32xf32, #tpu.memory_space<vmem>>, %arg17: memref<2x1x32xf32, #tpu.memory_space<vmem>>, %arg18: memref<2x6x32xf32, #tpu.memory_space<vmem>>, %arg19: memref<8x32xf32, #tpu.memory_space<vmem>>) attributes {dimension_semantics = [#tpu.dimension_semantics<parallel>], iteration_bounds = array<i64: 2>, scalar_prefetch = 0 : i64, scratch_operands = 0 : i64, tpu.core_type = #tpu.core_type<tc>, window_params = [{transform_indices = @transform_0, window_bounds = array<i64: 8, 4>}, {transform_indices = @transform_1, window_bounds = array<i64: 8, 32>}, {pipeline_mode = #tpu.pipeline_mode<synchronous>, transform_indices = @transform_2, window_bounds = array<i64: 8, 8>}, {pipeline_mode = #tpu.pipeline_mode<synchronous>, transform_indices = @transform_3, window_bounds = array<i64: 8, 32>}, {pipeline_mode = #tpu.pipeline_mode<synchronous>, transform_indices = @transform_4, window_bounds = array<i64: 4, 32>}, {pipeline_mode = #tpu.pipeline_mode<synchronous>, transform_indices = @transform_5, window_bounds = array<i64: 1, 32>}, {pipeline_mode = #tpu.pipeline_mode<synchronous>, transform_indices = @transform_6, window_bounds = array<i64: 2, 6, 32, 32>}, {pipeline_mode = #tpu.pipeline_mode<synchronous>, transform_indices = @transform_7, window_bounds = array<i64: 2, 2, 32, 32>}, {pipeline_mode = #tpu.pipeline_mode<synchronous>, transform_indices = @transform_8, window_bounds = array<i64: 2, 1, 32>}, {pipeline_mode = #tpu.pipeline_mode<synchronous>, transform_indices = @transform_9, window_bounds = array<i64: 2, 2, 32, 32>}, {pipeline_mode = #tpu.pipeline_mode<synchronous>, transform_indices = @transform_10, window_bounds = array<i64: 2, 4, 32, 32>}, {pipeline_mode = #tpu.pipeline_mode<synchronous>, transform_indices = @transform_11, window_bounds = array<i64: 2, 2, 32, 32>}, {pipeline_mode = #tpu.pipeline_mode<synchronous>, transform_indices = @transform_12, window_bounds = array<i64: 2, 1, 32>}, {pipeline_mode = #tpu.pipeline_mode<synchronous>, transform_indices = @transform_13, window_bounds = array<i64: 2, 32, 64>}, {pipeline_mode = #tpu.pipeline_mode<synchronous>, transform_indices = @transform_14, window_bounds = array<i64: 2, 1, 64>}, {pipeline_mode = #tpu.pipeline_mode<synchronous>, transform_indices = @transform_15, window_bounds = array<i64: 2, 64, 32>}, {pipeline_mode = #tpu.pipeline_mode<synchronous>, transform_indices = @transform_16, window_bounds = array<i64: 2, 1, 32>}, {pipeline_mode = #tpu.pipeline_mode<synchronous>, transform_indices = @transform_17, window_bounds = array<i64: 2, 6, 32>}, {transform_indices = @transform_18, window_bounds = array<i64: 8, 32>}]} {
    %c0 = arith.constant 0 : index
    %c0_0 = arith.constant 0 : index
    %0 = vector.load %arg3[%c0, %c0_0] : memref<8x8xf32, #tpu.memory_space<vmem>>, vector<8x8xf32>
    %cst = arith.constant 0.000000e+00 : f32
    %1 = vector.broadcast %cst : f32 to vector<8x8xf32>
    %2 = arith.cmpf one, %0, %1 : vector<8x8xf32>
    %cst_1 = arith.constant 0.000000e+00 : f32
    %cst_2 = arith.constant -1.000000e+09 : f32
    %3 = vector.broadcast %cst_1 : f32 to vector<8x8xf32>
    %4 = vector.broadcast %cst_2 : f32 to vector<8x8xf32>
    %5 = arith.select %2, %3, %4 : vector<8x8xi1>, vector<8x8xf32>
    %c0_3 = arith.constant 0 : index
    %c0_4 = arith.constant 0 : index
    %6 = vector.load %arg2[%c0_3, %c0_4] : memref<8x32xf32, #tpu.memory_space<vmem>>, vector<8x32xf32>
    %7 = vector.shape_cast %6 : vector<8x32xf32> to vector<1x8x32xf32>
    %8 = vector.broadcast %7 : vector<1x8x32xf32> to vector<4x8x32xf32>
    %c0_5 = arith.constant 0 : index
    %c0_6 = arith.constant 0 : index
    %9 = vector.load %arg1[%c0_5, %c0_6] : memref<8x4xf32, #tpu.memory_space<vmem>>, vector<8x4xf32>
    %c0_7 = arith.constant 0 : index
    %c0_8 = arith.constant 0 : index
    %10 = vector.load %arg5[%c0_7, %c0_8] : memref<4x32xf32, #tpu.memory_space<vmem>>, vector<4x32xf32>
    %cst_9 = arith.constant dense<0.000000e+00> : vector<8x32xf32>
    %11 = tpu.matmul %9, %10, %cst_9 {dimension_numbers = #tpu.dot_dimension_numbers<[1], [0], [0], [1], [0, 0, 1, 1], [], []>} : vector<8x4xf32>, vector<4x32xf32>, vector<8x32xf32> -> vector<8x32xf32>
    %c0_10 = arith.constant 0 : index
    %c0_11 = arith.constant 0 : index
    %12 = vector.load %arg6[%c0_10, %c0_11] : memref<1x32xf32, #tpu.memory_space<vmem>>, vector<1x32xf32>
    %13 = vector.broadcast %12 : vector<1x32xf32> to vector<8x32xf32>
    %14 = arith.addf %11, %13 : vector<8x32xf32>
    %cst_12 = arith.constant 5.65685415 : f32
    %15 = vector.broadcast %cst_12 : f32 to vector<8x32xf32>
    %16 = arith.mulf %14, %15 : vector<8x32xf32>
    %c0_13 = arith.constant 0 : index
    %c0_14 = arith.constant 0 : index
    %17 = vector.load %arg4[%c0_13, %c0_14] : memref<8x32xf32, #tpu.memory_space<vmem>>, vector<8x32xf32>
    %18 = arith.addf %16, %17 : vector<8x32xf32>
    %c0_15 = arith.constant 0 : index
    %c0_16 = arith.constant 0 : index
    %c0_17 = arith.constant 0 : index
    %19 = vector.load %arg18[%c0_15, %c0_16, %c0_17] : memref<2x6x32xf32, #tpu.memory_space<vmem>>, vector<1x6x32xf32>
    %20 = vector.shape_cast %19 : vector<1x6x32xf32> to vector<6x32xf32>
    %21 = vector.shape_cast %18 : vector<8x32xf32> to vector<1x8x32xf32>
    %22 = vector.broadcast %21 : vector<1x8x32xf32> to vector<6x8x32xf32>
    %c0_18 = arith.constant 0 : index
    %c0_19 = arith.constant 0 : index
    %c0_20 = arith.constant 0 : index
    %c0_21 = arith.constant 0 : index
    %23 = vector.load %arg7[%c0_18, %c0_19, %c0_20, %c0_21] : memref<2x6x32x32xf32, #tpu.memory_space<vmem>>, vector<1x6x32x32xf32>
    %24 = vector.shape_cast %23 : vector<1x6x32x32xf32> to vector<6x32x32xf32>
    "tpu.trace_start"() <{level = 10 : i32, message = "hsd,hde->hse"}> : () -> ()
    %cst_22 = arith.constant dense<0.000000e+00> : vector<6x8x32xf32>
    %25 = tpu.matmul %22, %24, %cst_22 {dimension_numbers = #tpu.dot_dimension_numbers<[2], [1], [1], [2], [0, 0, 0, 1, 1, 2], [0], [0]>} : vector<6x8x32xf32>, vector<6x32x32xf32>, vector<6x8x32xf32> -> vector<6x8x32xf32>
    "tpu.trace_stop"() : () -> ()
    %26 = vector.extract_strided_slice %25 {offsets = [0, 0, 0], sizes = [2, 8, 32], strides = [1, 1, 1]} : vector<6x8x32xf32> to vector<2x8x32xf32>
    %27 = vector.extract_strided_slice %25 {offsets = [2, 0, 0], sizes = [2, 8, 32], strides = [1, 1, 1]} : vector<6x8x32xf32> to vector<2x8x32xf32>
    %28 = vector.extract_strided_slice %25 {offsets = [4, 0, 0], sizes = [2, 8, 32], strides = [1, 1, 1]} : vector<6x8x32xf32> to vector<2x8x32xf32>
    %c0_23 = arith.constant 0 : index
    %c0_24 = arith.constant 0 : index
    %c0_25 = arith.constant 0 : index
    %c0_26 = arith.constant 0 : index
    %29 = vector.load %arg8[%c0_23, %c0_24, %c0_25, %c0_26] : memref<2x2x32x32xf32, #tpu.memory_space<vmem>>, vector<1x2x32x32xf32>
    %30 = vector.shape_cast %29 : vector<1x2x32x32xf32> to vector<2x32x32xf32>
    %c0_27 = arith.constant 0 : index
    %c0_28 = arith.constant 0 : index
    %c0_29 = arith.constant 0 : index
    %31 = vector.load %arg9[%c0_27, %c0_28, %c0_29] : memref<2x1x32xf32, #tpu.memory_space<vmem>>, vector<1x1x32xf32>
    %32 = vector.shape_cast %31 : vector<1x1x32xf32> to vector<1x32xf32>
    "tpu.trace_start"() <{level = 10 : i32, message = "hqd,hkd->hqk"}> : () -> ()
    %cst_30 = arith.constant dense<0.000000e+00> : vector<2x8x8xf32>
    %33 = tpu.matmul %26, %27, %cst_30 {dimension_numbers = #tpu.dot_dimension_numbers<[2], [2], [1], [1], [0, 0, 0, 1, 1, 1], [0], [0]>} : vector<2x8x32xf32>, vector<2x8x32xf32>, vector<2x8x8xf32> -> vector<2x8x8xf32>
    "tpu.trace_stop"() : () -> ()
    %34 = vector.shape_cast %5 : vector<8x8xf32> to vector<1x8x8xf32>
    %35 = vector.broadcast %34 : vector<1x8x8xf32> to vector<2x8x8xf32>
    %36 = arith.addf %33, %35 : vector<2x8x8xf32>
    %cst_31 = arith.constant dense<0xFF800000> : vector<2x8xf32>
    %37 = vector.multi_reduction <maximumf>, %36, %cst_31 [2] : vector<2x8x8xf32> to vector<2x8xf32>
    %38 = vector.shape_cast %37 : vector<2x8xf32> to vector<2x8x1xf32>
    %39 = vector.broadcast %38 : vector<2x8x1xf32> to vector<2x8x8xf32>
    %40 = arith.subf %36, %39 : vector<2x8x8xf32>
    %41 = math.exp %40 : vector<2x8x8xf32>
    %cst_32 = arith.constant dense<0.000000e+00> : vector<2x8xf32>
    %42 = vector.multi_reduction <add>, %41, %cst_32 [2] : vector<2x8x8xf32> to vector<2x8xf32>
    %43 = vector.shape_cast %42 : vector<2x8xf32> to vector<2x8x1xf32>
    %44 = vector.broadcast %43 : vector<2x8x1xf32> to vector<2x8x8xf32>
    %45 = arith.divf %41, %44 : vector<2x8x8xf32>
    "tpu.trace_start"() <{level = 10 : i32, message = "hqk,hkd->hqd"}> : () -> ()
    %cst_33 = arith.constant dense<0.000000e+00> : vector<2x8x32xf32>
    %46 = tpu.matmul %45, %28, %cst_33 {dimension_numbers = #tpu.dot_dimension_numbers<[2], [1], [1], [2], [0, 0, 0, 1, 1, 2], [0], [0]>} : vector<2x8x8xf32>, vector<2x8x32xf32>, vector<2x8x32xf32> -> vector<2x8x32xf32>
    "tpu.trace_stop"() : () -> ()
    "tpu.trace_start"() <{level = 10 : i32, message = "hqd,hde->hqe"}> : () -> ()
    %cst_34 = arith.constant dense<0.000000e+00> : vector<2x8x32xf32>
    %47 = tpu.matmul %46, %30, %cst_34 {dimension_numbers = #tpu.dot_dimension_numbers<[2], [1], [1], [2], [0, 0, 0, 1, 1, 2], [0], [0]>} : vector<2x8x32xf32>, vector<2x32x32xf32>, vector<2x8x32xf32> -> vector<2x8x32xf32>
    "tpu.trace_stop"() : () -> ()
    %cst_35 = arith.constant dense<0.000000e+00> : vector<8x32xf32>
    %48 = vector.multi_reduction <add>, %47, %cst_35 [0] : vector<2x8x32xf32> to vector<8x32xf32>
    %49 = vector.broadcast %32 : vector<1x32xf32> to vector<8x32xf32>
    %50 = arith.addf %48, %49 : vector<8x32xf32>
    %51 = arith.addf %18, %50 : vector<8x32xf32>
    %52 = vector.extract_strided_slice %20 {offsets = [0, 0], sizes = [1, 32], strides = [1, 1]} : vector<6x32xf32> to vector<1x32xf32>
    %53 = vector.extract_strided_slice %20 {offsets = [1, 0], sizes = [1, 32], strides = [1, 1]} : vector<6x32xf32> to vector<1x32xf32>
    %cst_36 = arith.constant dense<0.000000e+00> : vector<8xf32>
    %54 = vector.multi_reduction <add>, %51, %cst_36 [1] : vector<8x32xf32> to vector<8xf32>
    %55 = vector.shape_cast %54 : vector<8xf32> to vector<8x1xf32>
    %cst_37 = arith.constant 3.200000e+01 : f32
    %56 = vector.broadcast %cst_37 : f32 to vector<8x1xf32>
    %57 = arith.divf %55, %56 : vector<8x1xf32>
    %58 = vector.broadcast %57 : vector<8x1xf32> to vector<8x32xf32>
    %59 = arith.subf %51, %58 : vector<8x32xf32>
    %60 = arith.mulf %59, %59 : vector<8x32xf32>
    %cst_38 = arith.constant dense<0.000000e+00> : vector<8xf32>
    %61 = vector.multi_reduction <add>, %60, %cst_38 [1] : vector<8x32xf32> to vector<8xf32>
    %62 = vector.shape_cast %61 : vector<8xf32> to vector<8x1xf32>
    %cst_39 = arith.constant 3.200000e+01 : f32
    %63 = vector.broadcast %cst_39 : f32 to vector<8x1xf32>
    %64 = arith.divf %62, %63 : vector<8x1xf32>
    %65 = vector.broadcast %57 : vector<8x1xf32> to vector<8x32xf32>
    %66 = arith.subf %51, %65 : vector<8x32xf32>
    %cst_40 = arith.constant 9.99999974E-6 : f32
    %67 = vector.broadcast %cst_40 : f32 to vector<8x1xf32>
    %68 = arith.addf %64, %67 : vector<8x1xf32>
    %69 = math.rsqrt %68 : vector<8x1xf32>
    %70 = vector.broadcast %69 : vector<8x1xf32> to vector<8x32xf32>
    %71 = arith.mulf %66, %70 : vector<8x32xf32>
    %72 = vector.broadcast %52 : vector<1x32xf32> to vector<8x32xf32>
    %73 = arith.mulf %71, %72 : vector<8x32xf32>
    %74 = vector.broadcast %53 : vector<1x32xf32> to vector<8x32xf32>
    %75 = arith.addf %73, %74 : vector<8x32xf32>
    %76 = vector.shape_cast %75 : vector<8x32xf32> to vector<1x8x32xf32>
    %77 = vector.broadcast %76 : vector<1x8x32xf32> to vector<2x8x32xf32>
    %c0_41 = arith.constant 0 : index
    %c0_42 = arith.constant 0 : index
    %c0_43 = arith.constant 0 : index
    %c0_44 = arith.constant 0 : index
    %78 = vector.load %arg10[%c0_41, %c0_42, %c0_43, %c0_44] : memref<2x2x32x32xf32, #tpu.memory_space<vmem>>, vector<1x2x32x32xf32>
    %79 = vector.shape_cast %78 : vector<1x2x32x32xf32> to vector<2x32x32xf32>
    "tpu.trace_start"() <{level = 10 : i32, message = "hsd,hde->hse"}> : () -> ()
    %cst_45 = arith.constant dense<0.000000e+00> : vector<2x8x32xf32>
    %80 = tpu.matmul %77, %79, %cst_45 {dimension_numbers = #tpu.dot_dimension_numbers<[2], [1], [1], [2], [0, 0, 0, 1, 1, 2], [0], [0]>} : vector<2x8x32xf32>, vector<2x32x32xf32>, vector<2x8x32xf32> -> vector<2x8x32xf32>
    "tpu.trace_stop"() : () -> ()
    %c0_46 = arith.constant 0 : index
    %c0_47 = arith.constant 0 : index
    %c0_48 = arith.constant 0 : index
    %c0_49 = arith.constant 0 : index
    %81 = vector.load %arg11[%c0_46, %c0_47, %c0_48, %c0_49] : memref<2x4x32x32xf32, #tpu.memory_space<vmem>>, vector<1x4x32x32xf32>
    %82 = vector.shape_cast %81 : vector<1x4x32x32xf32> to vector<4x32x32xf32>
    "tpu.trace_start"() <{level = 10 : i32, message = "hsd,hde->hse"}> : () -> ()
    %cst_50 = arith.constant dense<0.000000e+00> : vector<4x8x32xf32>
    %83 = tpu.matmul %8, %82, %cst_50 {dimension_numbers = #tpu.dot_dimension_numbers<[2], [1], [1], [2], [0, 0, 0, 1, 1, 2], [0], [0]>} : vector<4x8x32xf32>, vector<4x32x32xf32>, vector<4x8x32xf32> -> vector<4x8x32xf32>
    "tpu.trace_stop"() : () -> ()
    %84 = vector.extract_strided_slice %83 {offsets = [0, 0, 0], sizes = [2, 8, 32], strides = [1, 1, 1]} : vector<4x8x32xf32> to vector<2x8x32xf32>
    %85 = vector.extract_strided_slice %83 {offsets = [2, 0, 0], sizes = [2, 8, 32], strides = [1, 1, 1]} : vector<4x8x32xf32> to vector<2x8x32xf32>
    %c0_51 = arith.constant 0 : index
    %c0_52 = arith.constant 0 : index
    %c0_53 = arith.constant 0 : index
    %c0_54 = arith.constant 0 : index
    %86 = vector.load %arg12[%c0_51, %c0_52, %c0_53, %c0_54] : memref<2x2x32x32xf32, #tpu.memory_space<vmem>>, vector<1x2x32x32xf32>
    %87 = vector.shape_cast %86 : vector<1x2x32x32xf32> to vector<2x32x32xf32>
    %c0_55 = arith.constant 0 : index
    %c0_56 = arith.constant 0 : index
    %c0_57 = arith.constant 0 : index
    %88 = vector.load %arg13[%c0_55, %c0_56, %c0_57] : memref<2x1x32xf32, #tpu.memory_space<vmem>>, vector<1x1x32xf32>
    %89 = vector.shape_cast %88 : vector<1x1x32xf32> to vector<1x32xf32>
    "tpu.trace_start"() <{level = 10 : i32, message = "hqd,hkd->hqk"}> : () -> ()
    %cst_58 = arith.constant dense<0.000000e+00> : vector<2x8x8xf32>
    %90 = tpu.matmul %80, %84, %cst_58 {dimension_numbers = #tpu.dot_dimension_numbers<[2], [2], [1], [1], [0, 0, 0, 1, 1, 1], [0], [0]>} : vector<2x8x32xf32>, vector<2x8x32xf32>, vector<2x8x8xf32> -> vector<2x8x8xf32>
    "tpu.trace_stop"() : () -> ()
    %cst_59 = arith.constant dense<0xFF800000> : vector<2x8xf32>
    %91 = vector.multi_reduction <maximumf>, %90, %cst_59 [2] : vector<2x8x8xf32> to vector<2x8xf32>
    %92 = vector.shape_cast %91 : vector<2x8xf32> to vector<2x8x1xf32>
    %93 = vector.broadcast %92 : vector<2x8x1xf32> to vector<2x8x8xf32>
    %94 = arith.subf %90, %93 : vector<2x8x8xf32>
    %95 = math.exp %94 : vector<2x8x8xf32>
    %cst_60 = arith.constant dense<0.000000e+00> : vector<2x8xf32>
    %96 = vector.multi_reduction <add>, %95, %cst_60 [2] : vector<2x8x8xf32> to vector<2x8xf32>
    %97 = vector.shape_cast %96 : vector<2x8xf32> to vector<2x8x1xf32>
    %98 = vector.broadcast %97 : vector<2x8x1xf32> to vector<2x8x8xf32>
    %99 = arith.divf %95, %98 : vector<2x8x8xf32>
    "tpu.trace_start"() <{level = 10 : i32, message = "hqk,hkd->hqd"}> : () -> ()
    %cst_61 = arith.constant dense<0.000000e+00> : vector<2x8x32xf32>
    %100 = tpu.matmul %99, %85, %cst_61 {dimension_numbers = #tpu.dot_dimension_numbers<[2], [1], [1], [2], [0, 0, 0, 1, 1, 2], [0], [0]>} : vector<2x8x8xf32>, vector<2x8x32xf32>, vector<2x8x32xf32> -> vector<2x8x32xf32>
    "tpu.trace_stop"() : () -> ()
    "tpu.trace_start"() <{level = 10 : i32, message = "hqd,hde->hqe"}> : () -> ()
    %cst_62 = arith.constant dense<0.000000e+00> : vector<2x8x32xf32>
    %101 = tpu.matmul %100, %87, %cst_62 {dimension_numbers = #tpu.dot_dimension_numbers<[2], [1], [1], [2], [0, 0, 0, 1, 1, 2], [0], [0]>} : vector<2x8x32xf32>, vector<2x32x32xf32>, vector<2x8x32xf32> -> vector<2x8x32xf32>
    "tpu.trace_stop"() : () -> ()
    %cst_63 = arith.constant dense<0.000000e+00> : vector<8x32xf32>
    %102 = vector.multi_reduction <add>, %101, %cst_63 [0] : vector<2x8x32xf32> to vector<8x32xf32>
    %103 = vector.broadcast %89 : vector<1x32xf32> to vector<8x32xf32>
    %104 = arith.addf %102, %103 : vector<8x32xf32>
    %105 = arith.addf %75, %104 : vector<8x32xf32>
    %106 = vector.extract_strided_slice %20 {offsets = [2, 0], sizes = [1, 32], strides = [1, 1]} : vector<6x32xf32> to vector<1x32xf32>
    %107 = vector.extract_strided_slice %20 {offsets = [3, 0], sizes = [1, 32], strides = [1, 1]} : vector<6x32xf32> to vector<1x32xf32>
    %cst_64 = arith.constant dense<0.000000e+00> : vector<8xf32>
    %108 = vector.multi_reduction <add>, %105, %cst_64 [1] : vector<8x32xf32> to vector<8xf32>
    %109 = vector.shape_cast %108 : vector<8xf32> to vector<8x1xf32>
    %cst_65 = arith.constant 3.200000e+01 : f32
    %110 = vector.broadcast %cst_65 : f32 to vector<8x1xf32>
    %111 = arith.divf %109, %110 : vector<8x1xf32>
    %112 = vector.broadcast %111 : vector<8x1xf32> to vector<8x32xf32>
    %113 = arith.subf %105, %112 : vector<8x32xf32>
    %114 = arith.mulf %113, %113 : vector<8x32xf32>
    %cst_66 = arith.constant dense<0.000000e+00> : vector<8xf32>
    %115 = vector.multi_reduction <add>, %114, %cst_66 [1] : vector<8x32xf32> to vector<8xf32>
    %116 = vector.shape_cast %115 : vector<8xf32> to vector<8x1xf32>
    %cst_67 = arith.constant 3.200000e+01 : f32
    %117 = vector.broadcast %cst_67 : f32 to vector<8x1xf32>
    %118 = arith.divf %116, %117 : vector<8x1xf32>
    %119 = vector.broadcast %111 : vector<8x1xf32> to vector<8x32xf32>
    %120 = arith.subf %105, %119 : vector<8x32xf32>
    %cst_68 = arith.constant 9.99999974E-6 : f32
    %121 = vector.broadcast %cst_68 : f32 to vector<8x1xf32>
    %122 = arith.addf %118, %121 : vector<8x1xf32>
    %123 = math.rsqrt %122 : vector<8x1xf32>
    %124 = vector.broadcast %123 : vector<8x1xf32> to vector<8x32xf32>
    %125 = arith.mulf %120, %124 : vector<8x32xf32>
    %126 = vector.broadcast %106 : vector<1x32xf32> to vector<8x32xf32>
    %127 = arith.mulf %125, %126 : vector<8x32xf32>
    %128 = vector.broadcast %107 : vector<1x32xf32> to vector<8x32xf32>
    %129 = arith.addf %127, %128 : vector<8x32xf32>
    %c0_69 = arith.constant 0 : index
    %c0_70 = arith.constant 0 : index
    %c0_71 = arith.constant 0 : index
    %130 = vector.load %arg14[%c0_69, %c0_70, %c0_71] : memref<2x32x64xf32, #tpu.memory_space<vmem>>, vector<1x32x64xf32>
    %131 = vector.shape_cast %130 : vector<1x32x64xf32> to vector<32x64xf32>
    %cst_72 = arith.constant dense<0.000000e+00> : vector<8x64xf32>
    %132 = tpu.matmul %129, %131, %cst_72 {dimension_numbers = #tpu.dot_dimension_numbers<[1], [0], [0], [1], [0, 0, 1, 1], [], []>} : vector<8x32xf32>, vector<32x64xf32>, vector<8x64xf32> -> vector<8x64xf32>
    %c0_73 = arith.constant 0 : index
    %c0_74 = arith.constant 0 : index
    %c0_75 = arith.constant 0 : index
    %133 = vector.load %arg15[%c0_73, %c0_74, %c0_75] : memref<2x1x64xf32, #tpu.memory_space<vmem>>, vector<1x1x64xf32>
    %134 = vector.shape_cast %133 : vector<1x1x64xf32> to vector<1x64xf32>
    %135 = vector.broadcast %134 : vector<1x64xf32> to vector<8x64xf32>
    %136 = arith.addf %132, %135 : vector<8x64xf32>
    %cst_76 = arith.constant 0.000000e+00 : f32
    %137 = vector.broadcast %cst_76 : f32 to vector<8x64xf32>
    %138 = arith.maximumf %136, %137 : vector<8x64xf32>
    %c0_77 = arith.constant 0 : index
    %c0_78 = arith.constant 0 : index
    %c0_79 = arith.constant 0 : index
    %139 = vector.load %arg16[%c0_77, %c0_78, %c0_79] : memref<2x64x32xf32, #tpu.memory_space<vmem>>, vector<1x64x32xf32>
    %140 = vector.shape_cast %139 : vector<1x64x32xf32> to vector<64x32xf32>
    %cst_80 = arith.constant dense<0.000000e+00> : vector<8x32xf32>
    %141 = tpu.matmul %138, %140, %cst_80 {dimension_numbers = #tpu.dot_dimension_numbers<[1], [0], [0], [1], [0, 0, 1, 1], [], []>} : vector<8x64xf32>, vector<64x32xf32>, vector<8x32xf32> -> vector<8x32xf32>
    %c0_81 = arith.constant 0 : index
    %c0_82 = arith.constant 0 : index
    %c0_83 = arith.constant 0 : index
    %142 = vector.load %arg17[%c0_81, %c0_82, %c0_83] : memref<2x1x32xf32, #tpu.memory_space<vmem>>, vector<1x1x32xf32>
    %143 = vector.shape_cast %142 : vector<1x1x32xf32> to vector<1x32xf32>
    %144 = vector.broadcast %143 : vector<1x32xf32> to vector<8x32xf32>
    %145 = arith.addf %141, %144 : vector<8x32xf32>
    %146 = arith.addf %129, %145 : vector<8x32xf32>
    %147 = vector.extract_strided_slice %20 {offsets = [4, 0], sizes = [1, 32], strides = [1, 1]} : vector<6x32xf32> to vector<1x32xf32>
    %148 = vector.extract_strided_slice %20 {offsets = [5, 0], sizes = [1, 32], strides = [1, 1]} : vector<6x32xf32> to vector<1x32xf32>
    %cst_84 = arith.constant dense<0.000000e+00> : vector<8xf32>
    %149 = vector.multi_reduction <add>, %146, %cst_84 [1] : vector<8x32xf32> to vector<8xf32>
    %150 = vector.shape_cast %149 : vector<8xf32> to vector<8x1xf32>
    %cst_85 = arith.constant 3.200000e+01 : f32
    %151 = vector.broadcast %cst_85 : f32 to vector<8x1xf32>
    %152 = arith.divf %150, %151 : vector<8x1xf32>
    %153 = vector.broadcast %152 : vector<8x1xf32> to vector<8x32xf32>
    %154 = arith.subf %146, %153 : vector<8x32xf32>
    %155 = arith.mulf %154, %154 : vector<8x32xf32>
    %cst_86 = arith.constant dense<0.000000e+00> : vector<8xf32>
    %156 = vector.multi_reduction <add>, %155, %cst_86 [1] : vector<8x32xf32> to vector<8xf32>
    %157 = vector.shape_cast %156 : vector<8xf32> to vector<8x1xf32>
    %cst_87 = arith.constant 3.200000e+01 : f32
    %158 = vector.broadcast %cst_87 : f32 to vector<8x1xf32>
    %159 = arith.divf %157, %158 : vector<8x1xf32>
    %160 = vector.broadcast %152 : vector<8x1xf32> to vector<8x32xf32>
    %161 = arith.subf %146, %160 : vector<8x32xf32>
    %cst_88 = arith.constant 9.99999974E-6 : f32
    %162 = vector.broadcast %cst_88 : f32 to vector<8x1xf32>
    %163 = arith.addf %159, %162 : vector<8x1xf32>
    %164 = math.rsqrt %163 : vector<8x1xf32>
    %165 = vector.broadcast %164 : vector<8x1xf32> to vector<8x32xf32>
    %166 = arith.mulf %161, %165 : vector<8x32xf32>
    %167 = vector.broadcast %147 : vector<1x32xf32> to vector<8x32xf32>
    %168 = arith.mulf %166, %167 : vector<8x32xf32>
    %169 = vector.broadcast %148 : vector<1x32xf32> to vector<8x32xf32>
    %170 = arith.addf %168, %169 : vector<8x32xf32>
    %c1 = arith.constant 1 : index
    %c0_89 = arith.constant 0 : index
    %c0_90 = arith.constant 0 : index
    %171 = vector.load %arg18[%c1, %c0_89, %c0_90] : memref<2x6x32xf32, #tpu.memory_space<vmem>>, vector<1x6x32xf32>
    %172 = vector.shape_cast %171 : vector<1x6x32xf32> to vector<6x32xf32>
    %173 = vector.shape_cast %170 : vector<8x32xf32> to vector<1x8x32xf32>
    %174 = vector.broadcast %173 : vector<1x8x32xf32> to vector<6x8x32xf32>
    %c1_91 = arith.constant 1 : index
    %c0_92 = arith.constant 0 : index
    %c0_93 = arith.constant 0 : index
    %c0_94 = arith.constant 0 : index
    %175 = vector.load %arg7[%c1_91, %c0_92, %c0_93, %c0_94] : memref<2x6x32x32xf32, #tpu.memory_space<vmem>>, vector<1x6x32x32xf32>
    %176 = vector.shape_cast %175 : vector<1x6x32x32xf32> to vector<6x32x32xf32>
    "tpu.trace_start"() <{level = 10 : i32, message = "hsd,hde->hse"}> : () -> ()
    %cst_95 = arith.constant dense<0.000000e+00> : vector<6x8x32xf32>
    %177 = tpu.matmul %174, %176, %cst_95 {dimension_numbers = #tpu.dot_dimension_numbers<[2], [1], [1], [2], [0, 0, 0, 1, 1, 2], [0], [0]>} : vector<6x8x32xf32>, vector<6x32x32xf32>, vector<6x8x32xf32> -> vector<6x8x32xf32>
    "tpu.trace_stop"() : () -> ()
    %178 = vector.extract_strided_slice %177 {offsets = [0, 0, 0], sizes = [2, 8, 32], strides = [1, 1, 1]} : vector<6x8x32xf32> to vector<2x8x32xf32>
    %179 = vector.extract_strided_slice %177 {offsets = [2, 0, 0], sizes = [2, 8, 32], strides = [1, 1, 1]} : vector<6x8x32xf32> to vector<2x8x32xf32>
    %180 = vector.extract_strided_slice %177 {offsets = [4, 0, 0], sizes = [2, 8, 32], strides = [1, 1, 1]} : vector<6x8x32xf32> to vector<2x8x32xf32>
    %c1_96 = arith.constant 1 : index
    %c0_97 = arith.constant 0 : index
    %c0_98 = arith.constant 0 : index
    %c0_99 = arith.constant 0 : index
    %181 = vector.load %arg8[%c1_96, %c0_97, %c0_98, %c0_99] : memref<2x2x32x32xf32, #tpu.memory_space<vmem>>, vector<1x2x32x32xf32>
    %182 = vector.shape_cast %181 : vector<1x2x32x32xf32> to vector<2x32x32xf32>
    %c1_100 = arith.constant 1 : index
    %c0_101 = arith.constant 0 : index
    %c0_102 = arith.constant 0 : index
    %183 = vector.load %arg9[%c1_100, %c0_101, %c0_102] : memref<2x1x32xf32, #tpu.memory_space<vmem>>, vector<1x1x32xf32>
    %184 = vector.shape_cast %183 : vector<1x1x32xf32> to vector<1x32xf32>
    "tpu.trace_start"() <{level = 10 : i32, message = "hqd,hkd->hqk"}> : () -> ()
    %cst_103 = arith.constant dense<0.000000e+00> : vector<2x8x8xf32>
    %185 = tpu.matmul %178, %179, %cst_103 {dimension_numbers = #tpu.dot_dimension_numbers<[2], [2], [1], [1], [0, 0, 0, 1, 1, 1], [0], [0]>} : vector<2x8x32xf32>, vector<2x8x32xf32>, vector<2x8x8xf32> -> vector<2x8x8xf32>
    "tpu.trace_stop"() : () -> ()
    %186 = vector.shape_cast %5 : vector<8x8xf32> to vector<1x8x8xf32>
    %187 = vector.broadcast %186 : vector<1x8x8xf32> to vector<2x8x8xf32>
    %188 = arith.addf %185, %187 : vector<2x8x8xf32>
    %cst_104 = arith.constant dense<0xFF800000> : vector<2x8xf32>
    %189 = vector.multi_reduction <maximumf>, %188, %cst_104 [2] : vector<2x8x8xf32> to vector<2x8xf32>
    %190 = vector.shape_cast %189 : vector<2x8xf32> to vector<2x8x1xf32>
    %191 = vector.broadcast %190 : vector<2x8x1xf32> to vector<2x8x8xf32>
    %192 = arith.subf %188, %191 : vector<2x8x8xf32>
    %193 = math.exp %192 : vector<2x8x8xf32>
    %cst_105 = arith.constant dense<0.000000e+00> : vector<2x8xf32>
    %194 = vector.multi_reduction <add>, %193, %cst_105 [2] : vector<2x8x8xf32> to vector<2x8xf32>
    %195 = vector.shape_cast %194 : vector<2x8xf32> to vector<2x8x1xf32>
    %196 = vector.broadcast %195 : vector<2x8x1xf32> to vector<2x8x8xf32>
    %197 = arith.divf %193, %196 : vector<2x8x8xf32>
    "tpu.trace_start"() <{level = 10 : i32, message = "hqk,hkd->hqd"}> : () -> ()
    %cst_106 = arith.constant dense<0.000000e+00> : vector<2x8x32xf32>
    %198 = tpu.matmul %197, %180, %cst_106 {dimension_numbers = #tpu.dot_dimension_numbers<[2], [1], [1], [2], [0, 0, 0, 1, 1, 2], [0], [0]>} : vector<2x8x8xf32>, vector<2x8x32xf32>, vector<2x8x32xf32> -> vector<2x8x32xf32>
    "tpu.trace_stop"() : () -> ()
    "tpu.trace_start"() <{level = 10 : i32, message = "hqd,hde->hqe"}> : () -> ()
    %cst_107 = arith.constant dense<0.000000e+00> : vector<2x8x32xf32>
    %199 = tpu.matmul %198, %182, %cst_107 {dimension_numbers = #tpu.dot_dimension_numbers<[2], [1], [1], [2], [0, 0, 0, 1, 1, 2], [0], [0]>} : vector<2x8x32xf32>, vector<2x32x32xf32>, vector<2x8x32xf32> -> vector<2x8x32xf32>
    "tpu.trace_stop"() : () -> ()
    %cst_108 = arith.constant dense<0.000000e+00> : vector<8x32xf32>
    %200 = vector.multi_reduction <add>, %199, %cst_108 [0] : vector<2x8x32xf32> to vector<8x32xf32>
    %201 = vector.broadcast %184 : vector<1x32xf32> to vector<8x32xf32>
    %202 = arith.addf %200, %201 : vector<8x32xf32>
    %203 = arith.addf %170, %202 : vector<8x32xf32>
    %204 = vector.extract_strided_slice %172 {offsets = [0, 0], sizes = [1, 32], strides = [1, 1]} : vector<6x32xf32> to vector<1x32xf32>
    %205 = vector.extract_strided_slice %172 {offsets = [1, 0], sizes = [1, 32], strides = [1, 1]} : vector<6x32xf32> to vector<1x32xf32>
    %cst_109 = arith.constant dense<0.000000e+00> : vector<8xf32>
    %206 = vector.multi_reduction <add>, %203, %cst_109 [1] : vector<8x32xf32> to vector<8xf32>
    %207 = vector.shape_cast %206 : vector<8xf32> to vector<8x1xf32>
    %cst_110 = arith.constant 3.200000e+01 : f32
    %208 = vector.broadcast %cst_110 : f32 to vector<8x1xf32>
    %209 = arith.divf %207, %208 : vector<8x1xf32>
    %210 = vector.broadcast %209 : vector<8x1xf32> to vector<8x32xf32>
    %211 = arith.subf %203, %210 : vector<8x32xf32>
    %212 = arith.mulf %211, %211 : vector<8x32xf32>
    %cst_111 = arith.constant dense<0.000000e+00> : vector<8xf32>
    %213 = vector.multi_reduction <add>, %212, %cst_111 [1] : vector<8x32xf32> to vector<8xf32>
    %214 = vector.shape_cast %213 : vector<8xf32> to vector<8x1xf32>
    %cst_112 = arith.constant 3.200000e+01 : f32
    %215 = vector.broadcast %cst_112 : f32 to vector<8x1xf32>
    %216 = arith.divf %214, %215 : vector<8x1xf32>
    %217 = vector.broadcast %209 : vector<8x1xf32> to vector<8x32xf32>
    %218 = arith.subf %203, %217 : vector<8x32xf32>
    %cst_113 = arith.constant 9.99999974E-6 : f32
    %219 = vector.broadcast %cst_113 : f32 to vector<8x1xf32>
    %220 = arith.addf %216, %219 : vector<8x1xf32>
    %221 = math.rsqrt %220 : vector<8x1xf32>
    %222 = vector.broadcast %221 : vector<8x1xf32> to vector<8x32xf32>
    %223 = arith.mulf %218, %222 : vector<8x32xf32>
    %224 = vector.broadcast %204 : vector<1x32xf32> to vector<8x32xf32>
    %225 = arith.mulf %223, %224 : vector<8x32xf32>
    %226 = vector.broadcast %205 : vector<1x32xf32> to vector<8x32xf32>
    %227 = arith.addf %225, %226 : vector<8x32xf32>
    %228 = vector.shape_cast %227 : vector<8x32xf32> to vector<1x8x32xf32>
    %229 = vector.broadcast %228 : vector<1x8x32xf32> to vector<2x8x32xf32>
    %c1_114 = arith.constant 1 : index
    %c0_115 = arith.constant 0 : index
    %c0_116 = arith.constant 0 : index
    %c0_117 = arith.constant 0 : index
    %230 = vector.load %arg10[%c1_114, %c0_115, %c0_116, %c0_117] : memref<2x2x32x32xf32, #tpu.memory_space<vmem>>, vector<1x2x32x32xf32>
    %231 = vector.shape_cast %230 : vector<1x2x32x32xf32> to vector<2x32x32xf32>
    "tpu.trace_start"() <{level = 10 : i32, message = "hsd,hde->hse"}> : () -> ()
    %cst_118 = arith.constant dense<0.000000e+00> : vector<2x8x32xf32>
    %232 = tpu.matmul %229, %231, %cst_118 {dimension_numbers = #tpu.dot_dimension_numbers<[2], [1], [1], [2], [0, 0, 0, 1, 1, 2], [0], [0]>} : vector<2x8x32xf32>, vector<2x32x32xf32>, vector<2x8x32xf32> -> vector<2x8x32xf32>
    "tpu.trace_stop"() : () -> ()
    %c1_119 = arith.constant 1 : index
    %c0_120 = arith.constant 0 : index
    %c0_121 = arith.constant 0 : index
    %c0_122 = arith.constant 0 : index
    %233 = vector.load %arg11[%c1_119, %c0_120, %c0_121, %c0_122] : memref<2x4x32x32xf32, #tpu.memory_space<vmem>>, vector<1x4x32x32xf32>
    %234 = vector.shape_cast %233 : vector<1x4x32x32xf32> to vector<4x32x32xf32>
    "tpu.trace_start"() <{level = 10 : i32, message = "hsd,hde->hse"}> : () -> ()
    %cst_123 = arith.constant dense<0.000000e+00> : vector<4x8x32xf32>
    %235 = tpu.matmul %8, %234, %cst_123 {dimension_numbers = #tpu.dot_dimension_numbers<[2], [1], [1], [2], [0, 0, 0, 1, 1, 2], [0], [0]>} : vector<4x8x32xf32>, vector<4x32x32xf32>, vector<4x8x32xf32> -> vector<4x8x32xf32>
    "tpu.trace_stop"() : () -> ()
    %236 = vector.extract_strided_slice %235 {offsets = [0, 0, 0], sizes = [2, 8, 32], strides = [1, 1, 1]} : vector<4x8x32xf32> to vector<2x8x32xf32>
    %237 = vector.extract_strided_slice %235 {offsets = [2, 0, 0], sizes = [2, 8, 32], strides = [1, 1, 1]} : vector<4x8x32xf32> to vector<2x8x32xf32>
    %c1_124 = arith.constant 1 : index
    %c0_125 = arith.constant 0 : index
    %c0_126 = arith.constant 0 : index
    %c0_127 = arith.constant 0 : index
    %238 = vector.load %arg12[%c1_124, %c0_125, %c0_126, %c0_127] : memref<2x2x32x32xf32, #tpu.memory_space<vmem>>, vector<1x2x32x32xf32>
    %239 = vector.shape_cast %238 : vector<1x2x32x32xf32> to vector<2x32x32xf32>
    %c1_128 = arith.constant 1 : index
    %c0_129 = arith.constant 0 : index
    %c0_130 = arith.constant 0 : index
    %240 = vector.load %arg13[%c1_128, %c0_129, %c0_130] : memref<2x1x32xf32, #tpu.memory_space<vmem>>, vector<1x1x32xf32>
    %241 = vector.shape_cast %240 : vector<1x1x32xf32> to vector<1x32xf32>
    "tpu.trace_start"() <{level = 10 : i32, message = "hqd,hkd->hqk"}> : () -> ()
    %cst_131 = arith.constant dense<0.000000e+00> : vector<2x8x8xf32>
    %242 = tpu.matmul %232, %236, %cst_131 {dimension_numbers = #tpu.dot_dimension_numbers<[2], [2], [1], [1], [0, 0, 0, 1, 1, 1], [0], [0]>} : vector<2x8x32xf32>, vector<2x8x32xf32>, vector<2x8x8xf32> -> vector<2x8x8xf32>
    "tpu.trace_stop"() : () -> ()
    %cst_132 = arith.constant dense<0xFF800000> : vector<2x8xf32>
    %243 = vector.multi_reduction <maximumf>, %242, %cst_132 [2] : vector<2x8x8xf32> to vector<2x8xf32>
    %244 = vector.shape_cast %243 : vector<2x8xf32> to vector<2x8x1xf32>
    %245 = vector.broadcast %244 : vector<2x8x1xf32> to vector<2x8x8xf32>
    %246 = arith.subf %242, %245 : vector<2x8x8xf32>
    %247 = math.exp %246 : vector<2x8x8xf32>
    %cst_133 = arith.constant dense<0.000000e+00> : vector<2x8xf32>
    %248 = vector.multi_reduction <add>, %247, %cst_133 [2] : vector<2x8x8xf32> to vector<2x8xf32>
    %249 = vector.shape_cast %248 : vector<2x8xf32> to vector<2x8x1xf32>
    %250 = vector.broadcast %249 : vector<2x8x1xf32> to vector<2x8x8xf32>
    %251 = arith.divf %247, %250 : vector<2x8x8xf32>
    "tpu.trace_start"() <{level = 10 : i32, message = "hqk,hkd->hqd"}> : () -> ()
    %cst_134 = arith.constant dense<0.000000e+00> : vector<2x8x32xf32>
    %252 = tpu.matmul %251, %237, %cst_134 {dimension_numbers = #tpu.dot_dimension_numbers<[2], [1], [1], [2], [0, 0, 0, 1, 1, 2], [0], [0]>} : vector<2x8x8xf32>, vector<2x8x32xf32>, vector<2x8x32xf32> -> vector<2x8x32xf32>
    "tpu.trace_stop"() : () -> ()
    "tpu.trace_start"() <{level = 10 : i32, message = "hqd,hde->hqe"}> : () -> ()
    %cst_135 = arith.constant dense<0.000000e+00> : vector<2x8x32xf32>
    %253 = tpu.matmul %252, %239, %cst_135 {dimension_numbers = #tpu.dot_dimension_numbers<[2], [1], [1], [2], [0, 0, 0, 1, 1, 2], [0], [0]>} : vector<2x8x32xf32>, vector<2x32x32xf32>, vector<2x8x32xf32> -> vector<2x8x32xf32>
    "tpu.trace_stop"() : () -> ()
    %cst_136 = arith.constant dense<0.000000e+00> : vector<8x32xf32>
    %254 = vector.multi_reduction <add>, %253, %cst_136 [0] : vector<2x8x32xf32> to vector<8x32xf32>
    %255 = vector.broadcast %241 : vector<1x32xf32> to vector<8x32xf32>
    %256 = arith.addf %254, %255 : vector<8x32xf32>
    %257 = arith.addf %227, %256 : vector<8x32xf32>
    %258 = vector.extract_strided_slice %172 {offsets = [2, 0], sizes = [1, 32], strides = [1, 1]} : vector<6x32xf32> to vector<1x32xf32>
    %259 = vector.extract_strided_slice %172 {offsets = [3, 0], sizes = [1, 32], strides = [1, 1]} : vector<6x32xf32> to vector<1x32xf32>
    %cst_137 = arith.constant dense<0.000000e+00> : vector<8xf32>
    %260 = vector.multi_reduction <add>, %257, %cst_137 [1] : vector<8x32xf32> to vector<8xf32>
    %261 = vector.shape_cast %260 : vector<8xf32> to vector<8x1xf32>
    %cst_138 = arith.constant 3.200000e+01 : f32
    %262 = vector.broadcast %cst_138 : f32 to vector<8x1xf32>
    %263 = arith.divf %261, %262 : vector<8x1xf32>
    %264 = vector.broadcast %263 : vector<8x1xf32> to vector<8x32xf32>
    %265 = arith.subf %257, %264 : vector<8x32xf32>
    %266 = arith.mulf %265, %265 : vector<8x32xf32>
    %cst_139 = arith.constant dense<0.000000e+00> : vector<8xf32>
    %267 = vector.multi_reduction <add>, %266, %cst_139 [1] : vector<8x32xf32> to vector<8xf32>
    %268 = vector.shape_cast %267 : vector<8xf32> to vector<8x1xf32>
    %cst_140 = arith.constant 3.200000e+01 : f32
    %269 = vector.broadcast %cst_140 : f32 to vector<8x1xf32>
    %270 = arith.divf %268, %269 : vector<8x1xf32>
    %271 = vector.broadcast %263 : vector<8x1xf32> to vector<8x32xf32>
    %272 = arith.subf %257, %271 : vector<8x32xf32>
    %cst_141 = arith.constant 9.99999974E-6 : f32
    %273 = vector.broadcast %cst_141 : f32 to vector<8x1xf32>
    %274 = arith.addf %270, %273 : vector<8x1xf32>
    %275 = math.rsqrt %274 : vector<8x1xf32>
    %276 = vector.broadcast %275 : vector<8x1xf32> to vector<8x32xf32>
    %277 = arith.mulf %272, %276 : vector<8x32xf32>
    %278 = vector.broadcast %258 : vector<1x32xf32> to vector<8x32xf32>
    %279 = arith.mulf %277, %278 : vector<8x32xf32>
    %280 = vector.broadcast %259 : vector<1x32xf32> to vector<8x32xf32>
    %281 = arith.addf %279, %280 : vector<8x32xf32>
    %c1_142 = arith.constant 1 : index
    %c0_143 = arith.constant 0 : index
    %c0_144 = arith.constant 0 : index
    %282 = vector.load %arg14[%c1_142, %c0_143, %c0_144] : memref<2x32x64xf32, #tpu.memory_space<vmem>>, vector<1x32x64xf32>
    %283 = vector.shape_cast %282 : vector<1x32x64xf32> to vector<32x64xf32>
    %cst_145 = arith.constant dense<0.000000e+00> : vector<8x64xf32>
    %284 = tpu.matmul %281, %283, %cst_145 {dimension_numbers = #tpu.dot_dimension_numbers<[1], [0], [0], [1], [0, 0, 1, 1], [], []>} : vector<8x32xf32>, vector<32x64xf32>, vector<8x64xf32> -> vector<8x64xf32>
    %c1_146 = arith.constant 1 : index
    %c0_147 = arith.constant 0 : index
    %c0_148 = arith.constant 0 : index
    %285 = vector.load %arg15[%c1_146, %c0_147, %c0_148] : memref<2x1x64xf32, #tpu.memory_space<vmem>>, vector<1x1x64xf32>
    %286 = vector.shape_cast %285 : vector<1x1x64xf32> to vector<1x64xf32>
    %287 = vector.broadcast %286 : vector<1x64xf32> to vector<8x64xf32>
    %288 = arith.addf %284, %287 : vector<8x64xf32>
    %cst_149 = arith.constant 0.000000e+00 : f32
    %289 = vector.broadcast %cst_149 : f32 to vector<8x64xf32>
    %290 = arith.maximumf %288, %289 : vector<8x64xf32>
    %c1_150 = arith.constant 1 : index
    %c0_151 = arith.constant 0 : index
    %c0_152 = arith.constant 0 : index
    %291 = vector.load %arg16[%c1_150, %c0_151, %c0_152] : memref<2x64x32xf32, #tpu.memory_space<vmem>>, vector<1x64x32xf32>
    %292 = vector.shape_cast %291 : vector<1x64x32xf32> to vector<64x32xf32>
    %cst_153 = arith.constant dense<0.000000e+00> : vector<8x32xf32>
    %293 = tpu.matmul %290, %292, %cst_153 {dimension_numbers = #tpu.dot_dimension_numbers<[1], [0], [0], [1], [0, 0, 1, 1], [], []>} : vector<8x64xf32>, vector<64x32xf32>, vector<8x32xf32> -> vector<8x32xf32>
    %c1_154 = arith.constant 1 : index
    %c0_155 = arith.constant 0 : index
    %c0_156 = arith.constant 0 : index
    %294 = vector.load %arg17[%c1_154, %c0_155, %c0_156] : memref<2x1x32xf32, #tpu.memory_space<vmem>>, vector<1x1x32xf32>
    %295 = vector.shape_cast %294 : vector<1x1x32xf32> to vector<1x32xf32>
    %296 = vector.broadcast %295 : vector<1x32xf32> to vector<8x32xf32>
    %297 = arith.addf %293, %296 : vector<8x32xf32>
    %298 = arith.addf %281, %297 : vector<8x32xf32>
    %299 = vector.extract_strided_slice %172 {offsets = [4, 0], sizes = [1, 32], strides = [1, 1]} : vector<6x32xf32> to vector<1x32xf32>
    %300 = vector.extract_strided_slice %172 {offsets = [5, 0], sizes = [1, 32], strides = [1, 1]} : vector<6x32xf32> to vector<1x32xf32>
    %cst_157 = arith.constant dense<0.000000e+00> : vector<8xf32>
    %301 = vector.multi_reduction <add>, %298, %cst_157 [1] : vector<8x32xf32> to vector<8xf32>
    %302 = vector.shape_cast %301 : vector<8xf32> to vector<8x1xf32>
    %cst_158 = arith.constant 3.200000e+01 : f32
    %303 = vector.broadcast %cst_158 : f32 to vector<8x1xf32>
    %304 = arith.divf %302, %303 : vector<8x1xf32>
    %305 = vector.broadcast %304 : vector<8x1xf32> to vector<8x32xf32>
    %306 = arith.subf %298, %305 : vector<8x32xf32>
    %307 = arith.mulf %306, %306 : vector<8x32xf32>
    %cst_159 = arith.constant dense<0.000000e+00> : vector<8xf32>
    %308 = vector.multi_reduction <add>, %307, %cst_159 [1] : vector<8x32xf32> to vector<8xf32>
    %309 = vector.shape_cast %308 : vector<8xf32> to vector<8x1xf32>
    %cst_160 = arith.constant 3.200000e+01 : f32
    %310 = vector.broadcast %cst_160 : f32 to vector<8x1xf32>
    %311 = arith.divf %309, %310 : vector<8x1xf32>
    %312 = vector.broadcast %304 : vector<8x1xf32> to vector<8x32xf32>
    %313 = arith.subf %298, %312 : vector<8x32xf32>
    %cst_161 = arith.constant 9.99999974E-6 : f32
    %314 = vector.broadcast %cst_161 : f32 to vector<8x1xf32>
    %315 = arith.addf %311, %314 : vector<8x1xf32>
    %316 = math.rsqrt %315 : vector<8x1xf32>
    %317 = vector.broadcast %316 : vector<8x1xf32> to vector<8x32xf32>
    %318 = arith.mulf %313, %317 : vector<8x32xf32>
    %319 = vector.broadcast %299 : vector<1x32xf32> to vector<8x32xf32>
    %320 = arith.mulf %318, %319 : vector<8x32xf32>
    %321 = vector.broadcast %300 : vector<1x32xf32> to vector<8x32xf32>
    %322 = arith.addf %320, %321 : vector<8x32xf32>
    %c0_162 = arith.constant 0 : index
    %c0_163 = arith.constant 0 : index
    %323 = vector.load %arg19[%c0_162, %c0_163] : memref<8x32xf32, #tpu.memory_space<vmem>>, vector<8x32xf32>
    tpu.vector_store %arg19[%c0_162, %c0_163], %322 {strides = array<i32>} : memref<8x32xf32, #tpu.memory_space<vmem>>, vector<8x32xf32>,
    return
  }
  func.func @transform_0(%arg0: i32) -> (i32, i32) {
    %c0_i32 = arith.constant 0 : i32
    %c0_i32_0 = arith.constant 0 : i32
    return %arg0, %c0_i32 : i32, i32
  }
  func.func @transform_1(%arg0: i32) -> (i32, i32) {
    %c0_i32 = arith.constant 0 : i32
    %c0_i32_0 = arith.constant 0 : i32
    return %arg0, %c0_i32 : i32, i32
  }
  func.func @transform_2(%arg0: i32) -> (i32, i32) {
    %c0_i32 = arith.constant 0 : i32
    %c0_i32_0 = arith.constant 0 : i32
    %c0_i32_1 = arith.constant 0 : i32
    return %c0_i32, %c0_i32_0 : i32, i32
  }
  func.func @transform_3(%arg0: i32) -> (i32, i32) {
    %c0_i32 = arith.constant 0 : i32
    %c0_i32_0 = arith.constant 0 : i32
    %c0_i32_1 = arith.constant 0 : i32
    return %c0_i32, %c0_i32_0 : i32, i32
  }
  func.func @transform_4(%arg0: i32) -> (i32, i32) {
    %c0_i32 = arith.constant 0 : i32
    %c0_i32_0 = arith.constant 0 : i32
    %c0_i32_1 = arith.constant 0 : i32
    return %c0_i32, %c0_i32_0 : i32, i32
  }
  func.func @transform_5(%arg0: i32) -> (i32, i32) {
    %c0_i32 = arith.constant 0 : i32
    %c0_i32_0 = arith.constant 0 : i32
    %c0_i32_1 = arith.constant 0 : i32
    return %c0_i32, %c0_i32_0 : i32, i32
  }
  func.func @transform_6(%arg0: i32) -> (i32, i32, i32, i32) {
    %c0_i32 = arith.constant 0 : i32
    %c0_i32_0 = arith.constant 0 : i32
    %c0_i32_1 = arith.constant 0 : i32
    %c0_i32_2 = arith.constant 0 : i32
    %c0_i32_3 = arith.constant 0 : i32
    return %c0_i32, %c0_i32_0, %c0_i32_1, %c0_i32_2 : i32, i32, i32, i32
  }
  func.func @transform_7(%arg0: i32) -> (i32, i32, i32, i32) {
    %c0_i32 = arith.constant 0 : i32
    %c0_i32_0 = arith.constant 0 : i32
    %c0_i32_1 = arith.constant 0 : i32
    %c0_i32_2 = arith.constant 0 : i32
    %c0_i32_3 = arith.constant 0 : i32
    return %c0_i32, %c0_i32_0, %c0_i32_1, %c0_i32_2 : i32, i32, i32, i32
  }
  func.func @transform_8(%arg0: i32) -> (i32, i32, i32) {
    %c0_i32 = arith.constant 0 : i32
    %c0_i32_0 = arith.constant 0 : i32
    %c0_i32_1 = arith.constant 0 : i32
    %c0_i32_2 = arith.constant 0 : i32
    return %c0_i32, %c0_i32_0, %c0_i32_1 : i32, i32, i32
  }
  func.func @transform_9(%arg0: i32) -> (i32, i32, i32, i32) {
    %c0_i32 = arith.constant 0 : i32
    %c0_i32_0 = arith.constant 0 : i32
    %c0_i32_1 = arith.constant 0 : i32
    %c0_i32_2 = arith.constant 0 : i32
    %c0_i32_3 = arith.constant 0 : i32
    return %c0_i32, %c0_i32_0, %c0_i32_1, %c0_i32_2 : i32, i32, i32, i32
  }
  func.func @transform_10(%arg0: i32) -> (i32, i32, i32, i32) {
    %c0_i32 = arith.constant 0 : i32
    %c0_i32_0 = arith.constant 0 : i32
    %c0_i32_1 = arith.constant 0 : i32
    %c0_i32_2 = arith.constant 0 : i32
    %c0_i32_3 = arith.constant 0 : i32
    return %c0_i32, %c0_i32_0, %c0_i32_1, %c0_i32_2 : i32, i32, i32, i32
  }
  func.func @transform_11(%arg0: i32) -> (i32, i32, i32, i32) {
    %c0_i32 = arith.constant 0 : i32
    %c0_i32_0 = arith.constant 0 : i32
    %c0_i32_1 = arith.constant 0 : i32
    %c0_i32_2 = arith.constant 0 : i32
    %c0_i32_3 = arith.constant 0 : i32
    return %c0_i32, %c0_i32_0, %c0_i32_1, %c0_i32_2 : i32, i32, i32, i32
  }
  func.func @transform_12(%arg0: i32) -> (i32, i32, i32) {
    %c0_i32 = arith.constant 0 : i32
    %c0_i32_0 = arith.constant 0 : i32
    %c0_i32_1 = arith.constant 0 : i32
    %c0_i32_2 = arith.constant 0 : i32
    return %c0_i32, %c0_i32_0, %c0_i32_1 : i32, i32, i32
  }
  func.func @transform_13(%arg0: i32) -> (i32, i32, i32) {
    %c0_i32 = arith.constant 0 : i32
    %c0_i32_0 = arith.constant 0 : i32
    %c0_i32_1 = arith.constant 0 : i32
    %c0_i32_2 = arith.constant 0 : i32
    return %c0_i32, %c0_i32_0, %c0_i32_1 : i32, i32, i32
  }
  func.func @transform_14(%arg0: i32) -> (i32, i32, i32) {
    %c0_i32 = arith.constant 0 : i32
    %c0_i32_0 = arith.constant 0 : i32
    %c0_i32_1 = arith.constant 0 : i32
    %c0_i32_2 = arith.constant 0 : i32
    return %c0_i32, %c0_i32_0, %c0_i32_1 : i32, i32, i32
  }
  func.func @transform_15(%arg0: i32) -> (i32, i32, i32) {
    %c0_i32 = arith.constant 0 : i32
    %c0_i32_0 = arith.constant 0 : i32
    %c0_i32_1 = arith.constant 0 : i32
    %c0_i32_2 = arith.constant 0 : i32
    return %c0_i32, %c0_i32_0, %c0_i32_1 : i32, i32, i32
  }
  func.func @transform_16(%arg0: i32) -> (i32, i32, i32) {
    %c0_i32 = arith.constant 0 : i32
    %c0_i32_0 = arith.constant 0 : i32
    %c0_i32_1 = arith.constant 0 : i32
    %c0_i32_2 = arith.constant 0 : i32
    return %c0_i32, %c0_i32_0, %c0_i32_1 : i32, i32, i32
  }
  func.func @transform_17(%arg0: i32) -> (i32, i32, i32) {
    %c0_i32 = arith.constant 0 : i32
    %c0_i32_0 = arith.constant 0 : i32
    %c0_i32_1 = arith.constant 0 : i32
    %c0_i32_2 = arith.constant 0 : i32
    return %c0_i32, %c0_i32_0, %c0_i32_1 : i32, i32, i32
  }
  func.func @transform_18(%arg0: i32) -> (i32, i32) {
    %c0_i32 = arith.constant 0 : i32
    %c0_i32_0 = arith.constant 0 : i32
    return %arg0, %c0_i32 : i32, i32
  }
}

</mosaic_0001>

<bundles_post_ra>
// kernel: decoder_forward.1
= control target key start
LH: loop header
LB: loop body
LE: loop exit
PB: predicated region body
PF: predicated region fallthrough
CT: control target
= control target key end

     0   :  { %s7500_s0 = inlined_call_operand.vmem [shape: f32[16,4], index: 0, kind: input, shape index: {}]   ;;  %s7501_s1 = inlined_call_operand.vmem [shape: f32[16,32], index: 1, kind: input, shape index: {}]   ;;  %s7502_s2 = inlined_call_operand.vmem [shape: f32[8,8], index: 2, kind: input, shape index: {}]   ;;  %s7503_s3 = inlined_call_operand.vmem [shape: f32[8,32], index: 3, kind: input, shape index: {}]   ;;  %s7504_s4 = inlined_call_operand.vmem [shape: f32[4,32], index: 4, kind: input, shape index: {}]   ;;  %s7505_s5 = inlined_call_operand.vmem [shape: f32[1,32], index: 5, kind: input, shape index: {}]   ;;  %s7506_s6 = inlined_call_operand.hbm [shape: f32[2,6,32,32], index: 6, kind: input, shape index: {}]   ;;  %s7507_s7 = inlined_call_operand.hbm [shape: f32[2,2,32,32], index: 7, kind: input, shape index: {}]   ;;  %s7508_s8 = inlined_call_operand.vmem [shape: f32[2,1,32], index: 8, kind: input, shape index: {}]   ;;  %s7509_s9 = inlined_call_operand.hbm [shape: f32[2,2,32,32], index: 9, kind: input, shape index: {}]   ;;  %s7510_s10 = inlined_call_operand.vmem [shape: f32[2,4,32,32], index: 10, kind: input, shape index: {}]   ;;  %s7511_s11 = inlined_call_operand.hbm [shape: f32[2,2,32,32], index: 11, kind: input, shape index: {}]   ;;  %s7512_s12 = inlined_call_operand.vmem [shape: f32[2,1,32], index: 12, kind: input, shape index: {}]   ;;  %s7513_s13 = inlined_call_operand.hbm [shape: f32[2,32,64], index: 13, kind: input, shape index: {}]   ;;  %s7514_s14 = inlined_call_operand.vmem [shape: f32[2,1,64], index: 14, kind: input, shape index: {}]   ;;  %s7515_s15 = inlined_call_operand.vmem [shape: f32[2,64,32], index: 15, kind: input, shape index: {}]   ;;  %s7516_s16 = inlined_call_operand.vmem [shape: f32[2,1,32], index: 16, kind: input, shape index: {}]   ;;  %s7517_s17 = inlined_call_operand.vmem [shape: f32[2,6,32], index: 17, kind: input, shape index: {}]   ;;  %s7518_s18 = inlined_call_operand.hbm [shape: f32[16,32], index: 18, kind: output, shape index: {}]  }
   0x1   :  { %7534 = sst [smem:[#allocation24_spill]] %s7500_s0 }
   0x2   :  { %7535 = sst [smem:[#allocation25_spill]] %s7501_s1 }
   0x3   :  { %7536 = sst [smem:[#allocation26_spill]] %s7502_s2 }
   0x4   :  { %7537 = sst [smem:[#allocation27_spill]] %s7507_s7 }
   0x5   :  { %7538 = sst [smem:[#allocation28_spill]] %s7514_s14 }
   0x6   :  { %7539 = sst [smem:[#allocation29_spill]] %s7516_s16 }
   0x7   :  { %7540 = sst [smem:[#allocation30_spill]] %s7518_s18 }
   0x8   :  { %23 = vsyncpa [#allocation3], 0 }
   0x9   :  { %24 = vsyncpa [#allocation6], 0 }
   0xa   :  { %25 = vsyncpa [#allocation9], 0 }
   0xb   :  { %26 = vsyncpa [#allocation4], 0 }
   0xc   :  { %28 = vsyncpa [#allocation4 + $0x1], 0  ;;  %s6661_s27 = smov 0   ;;  %s6663_s28 = smov 0  }
   0xd   :  { %s6665_s29 = smov 0   ;;  %s6667_s30 = smov 0  }
   0xe LB: > { %7541 = sst [smem:[#allocation16_spill]] %s6540_s27  ;;  %s6682_s0 = sadd.s32 4294967295, %s6552_s30   ;;  %s6552_s30 = sphi %s6667_s30, %s7575_s30   ;;  %s6548_s29 = sphi %s6665_s29, %s7578_s29   ;;  %s6544_s28 = sphi %s6663_s28, %s7577_s28   ;;  %s6540_s27 = sphi %s6661_s27, %s7576_s27  }
   0xf   : > { %7542 = sst [smem:[#allocation17_spill]] %s6544_s28  ;;  %s5130_s19 = sadd.s32 4294967294, %s6552_s30  }
  0x10   : > { %7543 = sst [smem:[#allocation18_spill]] %s6548_s29  ;;  %s6686_s1 = sadd.s32 1, %s6552_s30  }
  0x11   : > { %7544 = sst [smem:[#allocation19_spill]] %s6552_s30  ;;  %s429_s20 = sadd.s32 1, %s6548_s29 }
  0x12   : > { %7545 = sst [smem:[#allocation20_spill]] %s6686_s1  ;;  %s426_s21 = ssub.s32 %s6552_s30, %s6686_s1 }
  0x13   : > { %p439_p0 = scmp.ne.s32.totalorder %s6548_s29, %s6544_s28  ;;  %p427_p1 = scmp.eq.s32.totalorder %s426_s21, 0 }
  0x14   : > { %p440_p2 = scmp.eq.s32.totalorder %s6682_s0, 1  ;;  %p445_p3 = scmp.ne.s32.totalorder %s6544_s28, %s6540_s27 }
  0x15   : > { %p446_p4 = scmp.eq.s32.totalorder %s5130_s19, 1  ;;  %p5131_p7 = scmp.ge.s32.totalorder %s6552_s30, 1 }
  0x16   : > { %s6697_s22 = scalar_select %p427_p1, %s6548_s29, %s429_s20  }
  0x17   : > { %p6699_p5 = por %p440_p2, %p439_p0  ;;  %p6703_p6 = por %p446_p4, %p445_p3 }
  0x18   : > { %7546 = sst [smem:[#allocation21_spill]] %s6697_s22  ;;  %p453_p8 = scmp.lt.s32.totalorder %s6552_s30, 3 }
  0x19   : > { %s7547_s2 = scalar_select %p6699_p5, 1, 0 }
  0x1a   : > { %s7549_s23 = scalar_select %p6703_p6, 1, 0 }
  0x1b   : > { %7548 = sst [smem:[#allocation22_spill]] %s7547_s2  ;;  %p7526_p9 = scmp.eq.s32.totalorder %s6682_s0, 0 }
  0x1c   : > { %7550 = sst [smem:[#allocation23_spill]] %s7549_s23  ;;  %p6710_p10 = pnand %p5131_p7, %p453_p8 }
  0x1d   : > { %s6554_s25 = smov [#allocation5]   ;;  %s6555_s20 = smov [#allocation8]  }
  0x1e   : > { %s7551_s24 = scalar_select %p6710_p10, 1, 0 }
  0x1f   : > { %p6220_p11 = pneg %p6710_p10  ;;  %s490_s26 = sshll.u32 %s6554_s25, 4  ;;  %s6716_s26 = int_to_ptr.vmem [resolvable:$true] %s490_s26 }
  0x20   : > { %s522_s21 = sshll.u32 %s6555_s20, 4  ;;  %s6556_s22 = smov [#allocation2]   ;;  %s6724_s21 = int_to_ptr.vmem [resolvable:$true] %s522_s21 }
  0x21   : > { %p6720_p12 = pnand %p7526_p9, %p6220_p11  ;;  %s6726_s29 = sshll.u32 %s6556_s22, 4  ;;  %s478_s29 = int_to_ptr.vmem [resolvable:$true] %s6726_s29 }
  0x22   : > { %s7553_s7 = sld [smem:[#allocation27_spill]] }
  0x23   : > { %p6736_p0 = pneg %p6720_p12 }
  0x28   : > { %s6338_s27 = scalar_lea.hbm %s7553_s7, 2048 }
  0x29   : > { %p6339_p13 = scmp.ne.s32.totalorder %s7553_s7, %s6338_s27  ;;  %p6345_p3 = scmp.lt.u32.totalorder %s6338_s27, %s7553_s7 }
  0x2b   : > { %p6341_p1 = pnand %p6736_p0, %p6339_p13 }
  0x2d   : > { %p6342_p2 = pneg %p6341_p1 }
  0x2f   : > { %p6347_p4 = pnand %p6345_p3, %p6342_p2 }
  0x31   : > { %6350 = shalt.err (!%p6347_p4)
}
  0x32   : > { %s6351_s30 = scalar_lea.vmem %s6716_s26, 2048  ;;  %p6359_p9 = scmp.lt.s32.totalorder %s6716_s26, %s6716_s26 }
  0x33   : > { %p6352_p7 = scmp.ne.s32.totalorder %s6716_s26, %s6351_s30  ;;  %p6360_p6 = scmp.lt.s32.totalorder %s6351_s30, %s6351_s30 }
  0x35   : > { %p6354_p8 = pnand %p6352_p7, %p6736_p0  ;;  %p6361_p13 = por %p6360_p6, %p6359_p9 }
  0x37   : > { %p6355_p11 = pneg %p6354_p8 }
  0x39   : > { %p6362_p1 = pnand %p6361_p13, %p6355_p11 }
  0x3b   : > { %6365 = shalt.err (!%p6362_p1)
}
  0x3c   : > { %s6557_s1 = smov 128   ;;  %s6558_s27 = smov 8  }
  0x3d   : > { %6226 = dma.hbm_to_vmem [thread:$0]  (!%p6720_p12), %s7553_s7, 2048, %s6716_s26, [#allocation6], %s6557_s1, %s6557_s1, %s6558_s27  }
  0x3e   : > { %s6366_s30 = scalar_lea.hbm %s7511_s11, 2048 }
  0x3f   : > { %p6367_p6 = scmp.ne.s32.totalorder %s7511_s11, %s6366_s30  ;;  %p6373_p3 = scmp.lt.u32.totalorder %s6366_s30, %s7511_s11 }
  0x41   : > { %p6369_p9 = pnand %p6367_p6, %p6736_p0 }
  0x43   : > { %p6370_p2 = pneg %p6369_p9 }
  0x45   : > { %p6375_p4 = pnand %p6373_p3, %p6370_p2 }
  0x47   : > { %6378 = shalt.err (!%p6375_p4)
}
  0x48   : > { %s6379_s26 = scalar_lea.vmem %s6724_s21, 2048  ;;  %p6387_p13 = scmp.lt.s32.totalorder %s6724_s21, %s6724_s21 }
  0x49   : > { %p6380_p7 = scmp.ne.s32.totalorder %s6724_s21, %s6379_s26  ;;  %p6388_p1 = scmp.lt.s32.totalorder %s6379_s26, %s6379_s26 }
  0x4b   : > { %p6382_p8 = pnand %p6380_p7, %p6736_p0  ;;  %p6389_p6 = por %p6388_p1, %p6387_p13 }
  0x4d   : > { %p6383_p11 = pneg %p6382_p8 }
  0x4f   : > { %p6390_p9 = pnand %p6389_p6, %p6383_p11 }
  0x51   : > { %6393 = shalt.err (!%p6390_p9)
}
  0x52   : > { %6232 = dma.hbm_to_vmem [thread:$0]  (!%p6720_p12), %s7511_s11, 2048, %s6724_s21, [#allocation9], %s6557_s1, %s6557_s1, %s6558_s27  }
  0x53   : > { %s6394_s23 = scalar_lea.hbm %s7506_s6, 6144 }
  0x54   : > { %p6395_p2 = scmp.ne.s32.totalorder %s7506_s6, %s6394_s23  ;;  %p6401_p7 = scmp.lt.u32.totalorder %s6394_s23, %s7506_s6 }
  0x56   : > { %p6397_p3 = pnand %p6395_p2, %p6736_p0 }
  0x58   : > { %p6398_p4 = pneg %p6397_p3 }
  0x5a   : > { %p6403_p8 = pnand %p6401_p7, %p6398_p4 }
  0x5c   : > { %6406 = shalt.err (!%p6403_p8)
}
  0x5d   : > { %s6407_s26 = scalar_lea.vmem %s478_s29, 6144  ;;  %p6415_p6 = scmp.lt.s32.totalorder %s478_s29, %s478_s29 }
  0x5e   : > { %p6408_p11 = scmp.ne.s32.totalorder %s478_s29, %s6407_s26  ;;  %p6416_p9 = scmp.lt.s32.totalorder %s6407_s26, %s6407_s26 }
  0x60   : > { %p6410_p13 = pnand %p6408_p11, %p6736_p0  ;;  %p6417_p5 = por %p6416_p9, %p6415_p6 }
  0x62   : > { %p6411_p1 = pneg %p6410_p13 }
  0x64   : > { %p6418_p10 = pnand %p6417_p5, %p6411_p1 }
  0x66   : > { %6421 = shalt.err (!%p6418_p10)
}
  0x67   : > { %6223 = dma.hbm_to_vmem [thread:$0]  (!%p6720_p12), %s7506_s6, 6144, %s478_s29, [#allocation3], %s6557_s1, %s6557_s1, %s6558_s27  }
  0x68   : > { %s6559_s16 = smov [#allocation7]   ;;  %s6560_s2 = smov [#allocation10]  }
  0x69   : > { %s506_s28 = sshll.u32 %s6559_s16, 4  ;;  %s538_s23 = sshll.u32 %s6560_s2, 4  ;;  %s507_s28 = int_to_ptr.vmem [resolvable:$true] %s506_s28  ;;  %s539_s23 = int_to_ptr.vmem [resolvable:$true] %s538_s23 }
  0x6a   : > { %s6422_s22 = scalar_lea.hbm %s7509_s9, 2048 }
  0x6b   : > { %p6423_p5 = scmp.ne.s32.totalorder %s7509_s9, %s6422_s22  ;;  %p6429_p3 = scmp.lt.u32.totalorder %s6422_s22, %s7509_s9 }
  0x6d   : > { %p6425_p10 = pnand %p6423_p5, %p6736_p0 }
  0x6f   : > { %p6426_p2 = pneg %p6425_p10 }
  0x71   : > { %p6431_p4 = pnand %p6429_p3, %p6426_p2 }
  0x73   : > { %6434 = shalt.err (!%p6431_p4)
}
  0x74   : > { %s6435_s29 = scalar_lea.vmem %s507_s28, 2048  ;;  %p6443_p13 = scmp.lt.s32.totalorder %s507_s28, %s507_s28 }
  0x75   : > { %p6436_p7 = scmp.ne.s32.totalorder %s507_s28, %s6435_s29  ;;  %p6444_p1 = scmp.lt.s32.totalorder %s6435_s29, %s6435_s29 }
  0x77   : > { %p6438_p8 = pnand %p6436_p7, %p6736_p0  ;;  %p6445_p6 = por %p6444_p1, %p6443_p13 }
  0x79   : > { %p6439_p11 = pneg %p6438_p8 }
  0x7b   : > { %p6446_p9 = pnand %p6445_p6, %p6439_p11 }
  0x7d   : > { %6449 = shalt.err (!%p6446_p9)
}
  0x7e   : > { %6229 = dma.hbm_to_vmem [thread:$0]  (!%p6720_p12), %s7509_s9, 2048, %s507_s28, [#allocation6], %s6557_s1, %s6557_s1, %s6558_s27  }
  0x7f   : > { %s6450_s25 = scalar_lea.hbm %s7513_s13, 1024 }
  0x80   : > { %p6451_p5 = scmp.ne.s32.totalorder %s7513_s13, %s6450_s25  ;;  %p6457_p3 = scmp.lt.u32.totalorder %s6450_s25, %s7513_s13 }
  0x82   : > { %p6453_p10 = pnand %p6451_p5, %p6736_p0 }
  0x84   : > { %p6454_p2 = pneg %p6453_p10 }
  0x86   : > { %p6459_p4 = pnand %p6457_p3, %p6454_p2 }
  0x88   : > { %6462 = shalt.err (!%p6459_p4)
}
  0x89   : > { %s6463_s21 = scalar_lea.vmem %s539_s23, 1024  ;;  %p6471_p13 = scmp.lt.s32.totalorder %s539_s23, %s539_s23 }
  0x8a   : > { %p6464_p7 = scmp.ne.s32.totalorder %s539_s23, %s6463_s21  ;;  %p6472_p1 = scmp.lt.s32.totalorder %s6463_s21, %s6463_s21 }
  0x8c   : > { %p6466_p8 = pnand %p6464_p7, %p6736_p0  ;;  %p6473_p6 = por %p6472_p1, %p6471_p13 }
  0x8e   : > { %p6467_p11 = pneg %p6466_p8 }
  0x90   : > { %p6474_p9 = pnand %p6473_p6, %p6467_p11 }
  0x92   : > { %6477 = shalt.err (!%p6474_p9)
}
  0x93   : > { %6235 = dma.hbm_to_vmem [thread:$0]  (!%p6720_p12), %s7513_s13, 1024, %s539_s23, [#allocation9], %s6557_s1, %s6557_s1, %s6558_s27  }
  0x94   : > { %p7555_p5 = scmp.ne.s32.totalorder %s7551_s24, 0 }
  0x95   : > { %p7556_p0 = scmp.eq.s32.totalorder (!%p7555_p5), %s6682_s0, 0 }
  0x96   : > { %580 = sbr.rel (%p7555_p5) target bundleno = 7884 (0x1ecc), region = 92 }
  0x9d   : > { %6523 = dma.done.wait (%p7556_p0), [#allocation3], 6144   ;;  %p7557_p10 = pmov %p7556_p0 }
  0x9e   : > { %p7558_p2 = pmov %p7556_p0 }
  0x9f   : > { %6525 = vsyncadd (%p7557_p10), [#allocation3], 4294961152 }
  0xa0   : > { %6527 = dma.done.wait (%p7558_p2), [#allocation6], 4096   ;;  %p7559_p3 = pmov %p7556_p0 }
  0xa1   : > { %p7560_p4 = pmov %p7556_p0 }
  0xa2   : > { %6529 = vsyncadd (%p7559_p3), [#allocation6], 4294963200 }
  0xa3   : > { %6531 = dma.done.wait (%p7560_p4), [#allocation9], 3072   ;;  %p7561_p12 = pmov %p7556_p0 }
  0xa4   : > { %p653_p7 = scmp.lt.s32.totalorder %s6682_s0, 1  ;;  %v6561_v0 = vmov 0.0   ;;  %vm6562_vm0 = vmmov 0   ;;  %v6563_v1 = vmov 0.0|0.0   ;;  %vm678_vm1 = vcmask 1043456   ;;  %s7562_s27 = sld [smem:[#allocation24_spill]] }
  0xa5   : > { %6533 = vsyncadd (%p7561_p12), [#allocation9], 4294964224  ;;  %5473 = vmatprep.subr.mxu0 %v6561_v0  ;;  %5475 = vmatprep.mubr.msk.f32.mxu0 %vm6562_vm0, %v6561_v0  ;;  %vm674_vm2 = vcmask 31744   ;;  %v666_v2 = vld [vmem:[%s7504_s4] sm:$0xf]  ;;  %v757_v5 = vld [vmem:[#allocation2 + $0x8] sm:$0xff] }
  0xa6   : > { %s6869_s18 = scalar_select %p653_p7, %s6682_s0, 1  ;;  %5970 = vmatprep.subr.bf16.mxu1 %v6563_v1  ;;  %5486 = vmatprep.mubr.msk.f32.mxu1 %vm6562_vm0, %v6561_v0  ;;  %v756_v4 = vld [vmem:[#allocation2] sm:$0xff]  ;;  %v761_v8 = vld [vmem:[#allocation2 + $0x28] sm:$0xff]  ;;  %v758_v10 = vld [vmem:[#allocation2 + $0x10] sm:$0xff]  ;;  %vm780_vm3 = vcmask 261120   ;;  %vm1365_vm5 = vcmask 64512  }
  0xa7   : > { %5474 = vmatpush3.msk.msra.mxu0 %vm678_vm1, %v666_v2  ;;  %v760_v6 = vld [vmem:[#allocation2 + $0x20] sm:$0xff]  ;;  %v5971_v7 = vpack.c.bf16 %v757_v5, %v756_v4  ;;  %v759_v11 = vld [vmem:[#allocation2 + $0x18] sm:$0xff]  ;;  %v762_v12 = vld [vmem:[#allocation2 + $0x30] sm:$0xff]  ;;  %s7563_s26 = sld [smem:[#allocation26_spill]]  ;;  %v6564_v60 = vmov -1e+09  }
  0xa8   : > { %s5145_s24 = sshll.u32 %s6869_s18, 3  ;;  %5976 = vmatprep.subr.bf16.mxu0 %v6563_v1  ;;  %v5977_v9 = vpack.c.bf16 %v761_v8, %v760_v6  ;;  %v5974_v13 = vpack.c.bf16 %v759_v11, %v758_v10  ;;  %v763_v14 = vld [vmem:[#allocation2 + $0x38] sm:$0xff]  ;;  %v5147_v16 = vld [vmem:[%s7505_s5] ss:$0 sm:$0xff]  ;;  %v765_v21 = vld [vmem:[#allocation2 + $0x48] sm:$0xff]  ;;  %s7564_s14 = sld [smem:[#allocation25_spill]] }
  0xa9   : > { %5972 = vmatpush3.bf16.msra.mxu1 %v5971_v7  ;;  %v5980_v15 = vpack.c.bf16 %v763_v14, %v762_v12  ;;  %v764_v18 = vld [vmem:[#allocation2 + $0x40] sm:$0xff]  ;;  %v769_v23 = vld [vmem:[#allocation2 + $0x68] sm:$0xff]  ;;  %v766_v28 = vld [vmem:[#allocation2 + $0x50] sm:$0xff]  ;;  %vm2774_vm6 = vcmask 523264   ;;  %s7566_s25 = sld [smem:[#allocation29_spill]]  ;;  %s7567_s1 = sld [smem:[#allocation17_spill]] }
  0xaa   : > { %s656_s23 = scalar_lea.vmem %s7562_s27, %s5145_s24  ;;  %5973 = vmatprep.subr.bf16.mxu1 %v6563_v1  ;;  %v768_v22 = vld [vmem:[#allocation2 + $0x60] sm:$0xff]  ;;  %v5983_v26 = vpack.c.bf16 %v765_v21, %v764_v18  ;;  %v767_v30 = vld [vmem:[#allocation2 + $0x58] sm:$0xff]  ;;  %v770_v31 = vld [vmem:[#allocation2 + $0x70] sm:$0xff]  ;;  %s7568_s7 = sld [smem:[#allocation22_spill]] }
  0xab   : > { %v665_v3 = vld [vmem:[%s656_s23] sm:$0xff]  ;;  %v5989_v27 = vpack.c.bf16 %v769_v23, %v768_v22  ;;  %v771_v32 = vld [vmem:[#allocation2 + $0x78] sm:$0xff]  ;;  %v5986_v33 = vpack.c.bf16 %v767_v30, %v766_v28  ;;  %v773_v36 = vld [vmem:[#allocation2 + $0x88] sm:$0xff] }
  0xac   : > { %5476 = vmatmul.mubr.msk.f32.vlgmr.msra.gmra.mrb[0].mxu0 %vm674_vm2, %v665_v3  ;;  %v753_v24 = vld [vmem:[%s7503_s3] sm:$0xff]  ;;  %v5992_v34 = vpack.c.bf16 %v771_v32, %v770_v31  ;;  %v777_v38 = vld [vmem:[#allocation2 + $0xa8] sm:$0xff]  ;;  %v774_v41 = vld [vmem:[#allocation2 + $0x90] sm:$0xff] }
  0xad   : > { %5497 = vmatprep.mubr.msk.f32.mxu0 %vm6562_vm0, %v6561_v0  ;;  %5978 = vmatpush3.bf16.msra.mxu0 %v5977_v9  ;;  %v772_v35 = vld [vmem:[#allocation2 + $0x80] sm:$0xff]  ;;  %v775_v42 = vld [vmem:[#allocation2 + $0x98] sm:$0xff]  ;;  %v778_v43 = vld [vmem:[#allocation2 + $0xb0] sm:$0xff] }
  0xae   : > { %5979 = vmatprep.subr.bf16.mxu0 %v6563_v1  ;;  %5975 = vmatpush3.bf16.msra.mxu1 %v5974_v13  ;;  %v776_v37 = vld [vmem:[#allocation2 + $0xa0] sm:$0xff]  ;;  %v5995_v39 = vpack.c.bf16 %v773_v36, %v772_v35  ;;  %v779_v44 = vld [vmem:[#allocation2 + $0xb8] sm:$0xff]  ;;  %v5998_v45 = vpack.c.bf16 %v775_v42, %v774_v41  ;;  %v1205_v21 = vld [vmem:[#allocation5 + $0x8] sm:$0xff]  ;;  %s660_s16 = scalar_lea.vmem %s7564_s14, %s5145_s24  ;;  %s7565_s14 = sld [smem:[#allocation28_spill]] }
  0xaf   : > { %5982 = vmatprep.subr.bf16.mxu1 %v6563_v1  ;;  %v6001_v40 = vpack.c.bf16 %v777_v38, %v776_v37  ;;  %v6004_v46 = vpack.c.bf16 %v779_v44, %v778_v43  ;;  %v661_v59 = vld [vmem:[%s7563_s26] sm:$0xff]  ;;  %v1209_v28 = vld [vmem:[#allocation5 + $0x28] sm:$0xff]  ;;  %v1211_v35 = vld [vmem:[#allocation5 + $0x38] sm:$0xff]  ;;  %s650_s27 = sand.u32 1, %s7567_s1   ;;  %s7569_s26 = sld [smem:[#allocation30_spill]] }
  0xb0   : > { %vm662_vm4 = vcmp.ne.f32.partialorder %v661_v59, 0.0  ;;  %v1719_v59 = vld [vmem:[#allocation7 + $0x20] sm:$0xff]  ;;  %s5144_s23 = sshll.u32 %s650_s27, 3  ;;  %s4996_s24 = scalar_lea.sflag [#allocation4], %s650_s27 }
  0xb1   : > { %5981 = vmatpush3.bf16.msra.mxu0 %v5980_v15  ;;  %v6945_v61 = vsel %vm662_vm4, 0.0, %v6564_v60  ;;  %s652_s2 = scalar_lea.vmem [#allocation11], %s5144_s23  ;;  %p7570_p11 = scmp.ne.s32.totalorder %s7568_s7, 0 }
  0xb2   : > { %5988 = vmatprep.subr.bf16.mxu0 %v6563_v1  ;;  %s5009_s20 = sshll.u32 %s652_s2, 4  ;;  %s7459_s20 = int_to_ptr.vmem [resolvable:$true] %s5009_s20 }
  0xb3   : > { %s6478_s21 = scalar_lea.vmem %s7459_s20, 128 }
  0xb4   : > { %p6479_p8 = scmp.ne.s32.totalorder %s7459_s20, %s6478_s21 }
  0xb6   : > { %p6480_p13 = pnand %p6479_p8, %p7570_p11 }
  0xb8   : > { %p6481_p1 = pneg %p6480_p13 }
 0x17f   : > { %v748_v17 = vpop.f32.mrb[0].mxu0 }
 0x180   : > { %v749_v19 = vadd.f32 %v5147_v16, %v748_v17  ;;  %v5477_v20 = vpop.f32.mrb[1].mxu0 }
 0x181   : > { %v1204_v20 = vld [vmem:[#allocation5] sm:$0xff] }
 0x182   : > { %v752_v25 = vmul.f32 5.656854, %v749_v19  ;;  %v6007_v23 = vpack.c.bf16 %v1205_v21, %v1204_v20  ;;  %v1867_v20 = vld [vmem:[%s7510_s10 + $0x8] sm:$0xff]  ;;  %v1870_v21 = vld [vmem:[%s7510_s10 + $0x20] sm:$0xff] }
 0x184   : > { %v6896_v29 = vadd.f32 %v753_v24, %v752_v25  ;;  %v1206_v24 = vld [vmem:[#allocation5 + $0x10] sm:$0xff] }
 0x186   : > { %5487 = vmatmul.mubr.msk.f32.vlgmr.msra.gmra.mrb[0].mxu1 %vm780_vm3, %v6896_v29  ;;  %5498 = vmatmul.mubr.msk.f32.vlgmr.msra.gmra.mrb[2].mxu0 %vm780_vm3, %v6896_v29 }
 0x187   : > { %5984 = vmatpush3.bf16.msra.mxu1 %v5983_v26  ;;  %5990 = vmatpush3.bf16.msra.mxu0 %v5989_v27  ;;  %v1207_v26 = vld [vmem:[#allocation5 + $0x18] sm:$0xff]  ;;  %v1208_v27 = vld [vmem:[#allocation5 + $0x20] sm:$0xff] }
 0x188   : > { %5985 = vmatprep.subr.bf16.mxu1 %v6563_v1  ;;  %5991 = vmatprep.subr.bf16.mxu0 %v6563_v1  ;;  %v6010_v31 = vpack.c.bf16 %v1207_v26, %v1206_v24  ;;  %v6013_v32 = vpack.c.bf16 %v1209_v28, %v1208_v27  ;;  %v1868_v26 = vld [vmem:[%s7510_s10 + $0x10] sm:$0xff]  ;;  %v1869_v28 = vld [vmem:[%s7510_s10 + $0x18] sm:$0xff] }
 0x189   : > { %5508 = vmatprep.mubr.msk.f32.mxu1 %vm6562_vm0, %v6561_v0  ;;  %5519 = vmatprep.mubr.msk.f32.mxu0 %vm6562_vm0, %v6561_v0 }
 0x18b   : > { %5987 = vmatpush3.bf16.msra.mxu1 %v5986_v33  ;;  %5993 = vmatpush3.bf16.msra.mxu0 %v5992_v34  ;;  %v1210_v34 = vld [vmem:[#allocation5 + $0x30] sm:$0xff] }
 0x18c   : > { %5994 = vmatprep.subr.bf16.mxu1 %v6563_v1  ;;  %6000 = vmatprep.subr.bf16.mxu0 %v6563_v1  ;;  %v6016_v36 = vpack.c.bf16 %v1211_v35, %v1210_v34  ;;  %v1874_v34 = vld [vmem:[%s7510_s10 + $0x40] sm:$0xff]  ;;  %v1875_v35 = vld [vmem:[%s7510_s10 + $0x48] sm:$0xff] }
 0x18e   : > { %5509 = vmatmul.mubr.msk.f32.vlgmr.msra.gmra.mrb[2].mxu1 %vm780_vm3, %v6896_v29  ;;  %5520 = vmatmul.mubr.msk.f32.vlgmr.msra.gmra.mrb[4].mxu0 %vm780_vm3, %v6896_v29 }
 0x18f   : > { %5996 = vmatpush3.bf16.msra.mxu1 %v5995_v39  ;;  %6002 = vmatpush3.bf16.msra.mxu0 %v6001_v40 }
 0x190   : > { %5997 = vmatprep.subr.bf16.mxu1 %v6563_v1  ;;  %6003 = vmatprep.subr.bf16.mxu0 %v6563_v1 }
 0x191   : > { %5530 = vmatprep.mubr.msk.f32.mxu1 %vm6562_vm0, %v6561_v0  ;;  %5541 = vmatprep.mubr.msk.f32.mxu0 %vm6562_vm0, %v6561_v0 }
 0x193   : > { %5999 = vmatpush3.bf16.msra.mxu1 %v5998_v45  ;;  %6005 = vmatpush3.bf16.msra.mxu0 %v6004_v46  ;;  %v5164_v45 = vld [vmem:[%s7508_s8] ss:$0 sm:$0xff] }
 0x194   : > { %5544 = vmatprep.subr.mxu1 %v6561_v0  ;;  %5559 = vmatprep.subr.mxu0 %v6561_v0 }
 0x196   : > { %5531 = vmatmul.mubr.msk.f32.vlgmr.msra.gmra.mrb[4].mxu1 %vm780_vm3, %v6896_v29  ;;  %5542 = vmatmul.mubr.msk.f32.vlgmr.msra.gmra.mrb[6].mxu0 %vm780_vm3, %v6896_v29 }
 0x197   : > { %5546 = vmatprep.mubr.msk.f32.mxu1 %vm6562_vm0, %v6561_v0  ;;  %5561 = vmatprep.mubr.msk.f32.mxu0 %vm6562_vm0, %v6561_v0 }
 0x259   : > { %v850_v47 = vpop.f32.mrb[0].mxu1  ;;  %v920_v48 = vpop.f32.mrb[2].mxu0 }
 0x25a   : > { %v5488_v49 = vpop.f32.mrb[1].mxu1  ;;  %v5499_v50 = vpop.f32.mrb[3].mxu0 }
 0x261   : > { %v990_v51 = vpop.f32.mrb[2].mxu1  ;;  %v1060_v52 = vpop.f32.mrb[4].mxu0 }
 0x262   : > { %v5510_v53 = vpop.f32.mrb[3].mxu1  ;;  %v5521_v54 = vpop.f32.mrb[5].mxu0  ;;  %5545 = vmatpush3.xpose.msk.msra.mxu1 %vm780_vm3, %v990_v51 }
 0x263   : > { %5549 = vmatprep.subr.mxu1 %v6561_v0 }
 0x265   : > { %5547 = vmatmul.mubr.msk.f32.vlgmr.msra.gmra.mrb[6].mxu1 %vm780_vm3, %v850_v47 }
 0x266   : > { %5550 = vmatpush3.xpose.msk.msra.mxu1 %vm780_vm3, %v1060_v52  ;;  %5551 = vmatprep.mubr.msk.f32.mxu1 %vm6562_vm0, %v6561_v0 }
 0x267   : > { %5554 = vmatprep.subr.mxu1 %v6561_v0 }
 0x269   : > { %v1130_v55 = vpop.f32.mrb[4].mxu1  ;;  %v1200_v56 = vpop.f32.mrb[6].mxu0  ;;  %5552 = vmatmul.mubr.msk.f32.vlgmr.msra.gmra.mrb[8].mxu1 %vm780_vm3, %v920_v48 }
 0x26a   : > { %v5532_v57 = vpop.f32.mrb[5].mxu1  ;;  %v5543_v58 = vpop.f32.mrb[7].mxu0  ;;  %5555 = vmatpush3.msra.mxu1 %v1130_v55  ;;  %5560 = vmatpush3.msra.mxu0 %v1200_v56 }
 0x26b   : > { %5556 = vmatprep.mubr.msk.f32.mxu1 %vm6562_vm0, %v6561_v0  ;;  %6006 = vmatprep.subr.bf16.mxu1 %v6563_v1  ;;  %v1715_v57 = vld [vmem:[#allocation7] sm:$0xff]  ;;  %v1716_v58 = vld [vmem:[#allocation7 + $0x8] sm:$0xff] }
 0x26c   : > { %6012 = vmatprep.subr.bf16.mxu0 %v6563_v1  ;;  %v6019_v60 = vpack.c.bf16 %v1716_v58, %v1715_v57 }
 0x338   : > { %v1285_v62 = vpop.f32.mrb[6].mxu1 }
 0x339   : > { %v1286_v63 = vadd.f32 %v1285_v62, %v6945_v61  ;;  %v5548_v2 = vpop.f32.mrb[7].mxu1  ;;  %v1720_v62 = vld [vmem:[#allocation7 + $0x28] sm:$0xff] }
 0x33a   : > { %v1718_v2 = vld [vmem:[#allocation7 + $0x18] sm:$0xff] }
 0x33b   : > { %v1366_v3 = vsel %vm1365_vm5, %v1286_v63, -inf }
 0x33c   : > { %v1361_v4 = vpop.f32.mrb[8].mxu1  ;;  %1367 = vmax.xlane.f32.xlu0 %v1366_v3  ;;  %v1721_v3 = vld [vmem:[#allocation7 + $0x30] sm:$0xff] }
 0x33d   : > { %v1362_v5 = vadd.f32 %v1361_v4, %v6945_v61  ;;  %v5553_v6 = vpop.f32.mrb[9].mxu1 }
 0x33f   : > { %v1369_v7 = vsel %vm1365_vm5, %v1362_v5, -inf }
 0x340   : > { %1370 = vmax.xlane.f32.xlu0 %v1369_v7 }
 0x3c9   : > { %v1368_v8 = vpop.xlane.xlu0 %1367 }
 0x3ca   : > { %v1372_v9 = vsub.f32 %v1286_v63, %v1368_v8  ;;  %v6025_v63 = vpack.c.bf16 %v1720_v62, %v1719_v59 }
 0x3cc   : > { %v1374_v10 = vmul.f32 1.442695, %v1372_v9  ;;  %v1705_v9 = vlaneseq }
 0x3cd   : > { %v1371_v11 = vpop.xlane.xlu0 %1370 }
 0x3ce   : > { %6294 = vpow2.f32 %v1374_v10  ;;  %v1373_v12 = vsub.f32 %v1362_v5, %v1371_v11  ;;  %v1722_v5 = vld [vmem:[#allocation7 + $0x38] sm:$0xff]  ;;  %v6981_v11 = vshrl.u32 %v1705_v9, 7 }
 0x3cf   : > { %v6028_v6 = vpack.c.bf16 %v1722_v5, %v1721_v3 }
 0x3d0   : > { %v1376_v13 = vmul.f32 1.442695, %v1373_v12  ;;  %v1707_v12 = vsub.s32 0, %v6981_v11 }
 0x3d2   : > { %6296 = vpow2.f32 %v1376_v13  ;;  %v6987_v13 = vld [vmem:[%s7517_s17] sm:$0x3f] }
 0x3d8   : > { %v6295_v14 = vpop.eup %6294 }
 0x3d9   : > { %v1378_v15 = vsel %vm1365_vm5, %v6295_v14, 0.0 }
 0x3da   : > { %1379 = vadd.xlane.f32.xlu1 %v1378_v15  ;;  %v1708_v15 = vrot.slane %v6987_v13, %v1707_v12 }
 0x3dc   : > { %v6297_v16 = vpop.eup %6296 }
 0x3dd   : > { %v1381_v17 = vsel %vm1365_vm5, %v6297_v16, 0.0 }
 0x3de   : > { %1382 = vadd.xlane.f32.xlu1 %v1381_v17  ;;  %v1866_v17 = vld [vmem:[%s7510_s10] sm:$0xff] }
 0x3df   : > { %v6031_v24 = vpack.c.bf16 %v1867_v20, %v1866_v17  ;;  %v2166_v20 = vld [vmem:[#allocation8 + $0x8] sm:$0xff] }
 0x467   : > { %v1380_v18 = vpop.xlane.xlu1 %1379 }
 0x468   : > { %6298 = vrcp.f32 %v1380_v18 }
 0x46b   : > { %v1383_v19 = vpop.xlane.xlu1 %1382 }
 0x46c   : > { %6300 = vrcp.f32 %v1383_v19 }
 0x472   : > { %v6299_v22 = vpop.eup %6298 }
 0x473   : > { %v1385_v25 = vmul.f32 %v6299_v22, %v6295_v14  ;;  %v1712_v14 = vsub.s32 1, %v6981_v11  ;;  %v1871_v22 = vld [vmem:[%s7510_s10 + $0x28] sm:$0xff] }
 0x475   : > { %5557 = vmatmul.mubr.msk.f32.vlgmr.msra.gmra.mrb[10].mxu1 %vm1365_vm5, %v1385_v25  ;;  %v1713_v19 = vrot.slane %v6987_v13, %v1712_v14  ;;  %v6037_v25 = vpack.c.bf16 %v1871_v22, %v1870_v21  ;;  %v2169_v21 = vld [vmem:[#allocation8 + $0x20] sm:$0xff]  ;;  %v2170_v22 = vld [vmem:[#allocation8 + $0x28] sm:$0xff] }
 0x476   : > { %v6301_v30 = vpop.eup %6300  ;;  %6008 = vmatpush3.bf16.msra.mxu1 %v6007_v23  ;;  %5572 = vmatprep.mubr.msk.f32.mxu1 %vm6562_vm0, %v6561_v0 }
 0x477   : > { %v1387_v33 = vmul.f32 %v6301_v30, %v6297_v16  ;;  %6009 = vmatprep.subr.bf16.mxu1 %v6563_v1  ;;  %v1872_v30 = vld [vmem:[%s7510_s10 + $0x30] sm:$0xff] }
 0x479   : > { %5562 = vmatmul.mubr.msk.f32.vlgmr.msra.gmra.mrb[8].mxu0 %vm1365_vm5, %v1387_v33 }
 0x47a   : > { %6011 = vmatpush3.bf16.msra.mxu1 %v6010_v31  ;;  %6014 = vmatpush3.bf16.msra.mxu0 %v6013_v32  ;;  %v1873_v31 = vld [vmem:[%s7510_s10 + $0x38] sm:$0xff]  ;;  %v6034_v32 = vpack.c.bf16 %v1869_v28, %v1868_v26  ;;  %v6061_v28 = vpack.c.bf16 %v2170_v22, %v2169_v21 }
 0x47b   : > { %6015 = vmatprep.subr.bf16.mxu0 %v6563_v1  ;;  %5583 = vmatprep.mubr.msk.f32.mxu0 %vm6562_vm0, %v6561_v0  ;;  %v6040_v33 = vpack.c.bf16 %v1873_v31, %v1872_v30  ;;  %v2167_v30 = vld [vmem:[#allocation8 + $0x10] sm:$0xff]  ;;  %v2168_v31 = vld [vmem:[#allocation8 + $0x18] sm:$0xff] }
 0x47c   : > { %6018 = vmatprep.subr.bf16.mxu1 %v6563_v1 }
 0x47e   : > { %6017 = vmatpush3.bf16.msra.mxu0 %v6016_v36  ;;  %v1878_v36 = vld [vmem:[%s7510_s10 + $0x60] sm:$0xff] }
 0x47f   : > { %6024 = vmatprep.subr.bf16.mxu0 %v6563_v1 }
 0x548   : > { %v1457_v37 = vpop.f32.mrb[10].mxu1 }
 0x549   : > { %v5558_v38 = vpop.f32.mrb[11].mxu1  ;;  %5573 = vmatmul.mubr.msk.f32.vlgmr.msra.gmra.mrb[12].mxu1 %vm780_vm3, %v1457_v37  ;;  %v1879_v37 = vld [vmem:[%s7510_s10 + $0x68] sm:$0xff] }
 0x54a   : > { %5594 = vmatprep.mubr.msk.f32.mxu1 %vm6562_vm0, %v6561_v0  ;;  %6020 = vmatpush3.bf16.msra.mxu1 %v6019_v60  ;;  %v7049_v38 = vld [vmem:[%s660_s16] sm:$0xff]  ;;  %s5248_s16 = sshll.u32 %s6682_s0, 7  ;;  %s6565_s0 = smov [#allocation11]  }
 0x54b   : > { %6021 = vmatprep.subr.bf16.mxu1 %v6563_v1  ;;  %s7457_s18 = scalar_lea.hbm %s7569_s26, %s5248_s16  ;;  %s6482_s28 = sshll.u32 %s6565_s0, 4  ;;  %s6483_s28 = int_to_ptr.vmem [resolvable:$false] %s6482_s28 }
 0x54c   : > { %v1530_v39 = vpop.f32.mrb[8].mxu0  ;;  %s6484_s29 = scalar_lea.vmem %s6483_s28, 256  ;;  %p6485_p6 = scmp.lt.s32.totalorder %s7459_s20, %s6483_s28 }
 0x54d   : > { %v5563_v40 = vpop.f32.mrb[9].mxu0  ;;  %5584 = vmatmul.mubr.msk.f32.vlgmr.msra.gmra.mrb[10].mxu0 %vm780_vm3, %v1530_v39  ;;  %v6043_v39 = vpack.c.bf16 %v1875_v35, %v1874_v34  ;;  %v2172_v34 = vld [vmem:[#allocation8 + $0x38] sm:$0xff]  ;;  %v6058_v35 = vpack.c.bf16 %v2168_v31, %v2167_v30  ;;  %v5180_v30 = vld [vmem:[%s7565_s14] ss:$0 sm:$0xff]  ;;  %p6486_p9 = scmp.lt.s32.totalorder %s6484_s29, %s6478_s21 }
 0x54e   : > { %5605 = vmatprep.mubr.msk.f32.mxu0 %vm6562_vm0, %v6561_v0  ;;  %6026 = vmatpush3.bf16.msra.mxu0 %v6025_v63  ;;  %v6049_v40 = vpack.c.bf16 %v1879_v37, %v1878_v36 }
 0x54f   : > { %6027 = vmatprep.subr.bf16.mxu0 %v6563_v1  ;;  %p6487_p5 = por %p6486_p9, %p6485_p6 }
 0x551   : > { %p6488_p0 = pnand %p6487_p5, %p6481_p1 }
 0x552   : > { %6029 = vmatpush3.bf16.msra.mxu0 %v6028_v6 }
 0x553   : > { %6036 = vmatprep.subr.bf16.mxu0 %v6563_v1 }
 0x61c   : > { %v1603_v41 = vpop.f32.mrb[12].mxu1 }
 0x61d   : > { %v5574_v42 = vpop.f32.mrb[13].mxu1  ;;  %v1680_v44 = vsel %vm780_vm3, %v1603_v41, 0.0  ;;  %v1876_v41 = vld [vmem:[%s7510_s10 + $0x50] sm:$0xff] }
 0x61e   : > { %v1877_v42 = vld [vmem:[%s7510_s10 + $0x58] sm:$0xff] }
 0x620   : > { %v1676_v43 = vpop.f32.mrb[10].mxu0 }
 0x621   : > { %v1681_v46 = vsel %vm780_vm3, %v1676_v43, 0.0  ;;  %v5585_v47 = vpop.f32.mrb[11].mxu0  ;;  %v1880_v43 = vld [vmem:[%s7510_s10 + $0x70] sm:$0xff] }
 0x622   : > { %v1682_v48 = vadd.f32 %v1681_v46, %v1680_v44  ;;  %v1881_v44 = vld [vmem:[%s7510_s10 + $0x78] sm:$0xff] }
 0x623   : > { %v6052_v46 = vpack.c.bf16 %v1881_v44, %v1880_v43 }
 0x624   : > { %v1689_v49 = vadd.f32 %v5164_v45, %v1682_v48  ;;  %v6046_v45 = vpack.c.bf16 %v1877_v42, %v1876_v41 }
 0x626   : > { %v1690_v50 = vadd.f32 %v1689_v49, %v6896_v29  ;;  %v1717_v29 = vld [vmem:[#allocation7 + $0x10] sm:$0xff] }
 0x627   : > { %v6022_v4 = vpack.c.bf16 %v1718_v2, %v1717_v29 }
 0x628   : > { %v1691_v51 = vsel %vm780_vm3, %v1690_v50, 0.0 }
 0x629   : > { %1692 = vadd.xlane.f32.xlu0 %v1691_v51  ;;  %6023 = vmatpush3.bf16.msra.mxu1 %v6022_v4 }
 0x62a   : > { %6030 = vmatprep.subr.bf16.mxu1 %v6563_v1 }
 0x6b6   : > { %v1693_v52 = vpop.xlane.xlu0 %1692 }
 0x6b7   : > { %v1695_v53 = vmul.f32 0.03125, %v1693_v52 }
 0x6b9   : > { %v1696_v54 = vsub.f32 %v1690_v50, %v1695_v53 }
 0x6bb   : > { %v1697_v55 = vmul.f32 %v1696_v54, %v1696_v54 }
 0x6bd   : > { %v1698_v56 = vsel %vm780_vm3, %v1697_v55, 0.0 }
 0x6be   : > { %1699 = vadd.xlane.f32.xlu1 %v1698_v56 }
 0x74b   : > { %v1700_v7 = vpop.xlane.xlu1 %1699 }
 0x74c   : > { %v1701_v8 = vmul.f32 0.03125, %v1700_v7 }
 0x74e   : > { %v1702_v10 = vadd.f32 1e-05, %v1701_v8 }
 0x750   : > { %6302 = vrsqrt.f32 %v1702_v10 }
 0x75a   : > { %v6303_v16 = vpop.eup %6302 }
 0x75b   : > { %v1704_v18 = vmul.f32 %v6303_v16, %v1696_v54 }
 0x75d   : > { %v1709_v23 = vmul.f32 %v1708_v15, %v1704_v18 }
 0x75f   : > { %v7011_v27 = vadd.f32 %v1713_v19, %v1709_v23  ;;  %v2165_v19 = vld [vmem:[#allocation8] sm:$0xff] }
 0x761   : > { %5595 = vmatmul.mubr.msk.f32.vlgmr.msra.gmra.mrb[14].mxu1 %vm780_vm3, %v7011_v27  ;;  %5606 = vmatmul.mubr.msk.f32.vlgmr.msra.gmra.mrb[12].mxu0 %vm780_vm3, %v7011_v27 }
 0x762   : > { %6032 = vmatpush3.bf16.msra.mxu1 %v6031_v24  ;;  %6038 = vmatpush3.bf16.msra.mxu0 %v6037_v25  ;;  %v6055_v24 = vpack.c.bf16 %v2166_v20, %v2165_v19 }
 0x763   : > { %6033 = vmatprep.subr.bf16.mxu1 %v6563_v1  ;;  %6039 = vmatprep.subr.bf16.mxu0 %v6563_v1 }
 0x764   : > { %5616 = vmatprep.mubr.msk.f32.mxu1 %vm6562_vm0, %v6561_v0  ;;  %5627 = vmatprep.mubr.msk.f32.mxu0 %vm6562_vm0, %v6561_v0 }
 0x766   : > { %6035 = vmatpush3.bf16.msra.mxu1 %v6034_v32  ;;  %6041 = vmatpush3.bf16.msra.mxu0 %v6040_v33  ;;  %v2171_v33 = vld [vmem:[#allocation8 + $0x30] sm:$0xff] }
 0x767   : > { %6042 = vmatprep.subr.bf16.mxu1 %v6563_v1  ;;  %6048 = vmatprep.subr.bf16.mxu0 %v6563_v1  ;;  %v6064_v36 = vpack.c.bf16 %v2172_v34, %v2171_v33 }
 0x769   : > { %5617 = vmatmul.mubr.msk.f32.vlgmr.msra.gmra.mrb[16].mxu1 %vm780_vm3, %v7049_v38  ;;  %5628 = vmatmul.mubr.msk.f32.vlgmr.msra.gmra.mrb[14].mxu0 %vm780_vm3, %v7049_v38 }
 0x76a   : > { %6044 = vmatpush3.bf16.msra.mxu1 %v6043_v39  ;;  %6050 = vmatpush3.bf16.msra.mxu0 %v6049_v40 }
 0x76b   : > { %6045 = vmatprep.subr.bf16.mxu1 %v6563_v1  ;;  %6051 = vmatprep.subr.bf16.mxu0 %v6563_v1 }
 0x76c   : > { %5638 = vmatprep.mubr.msk.f32.mxu1 %vm6562_vm0, %v6561_v0  ;;  %5649 = vmatprep.mubr.msk.f32.mxu0 %vm6562_vm0, %v6561_v0 }
 0x76e   : > { %6047 = vmatpush3.bf16.msra.mxu1 %v6046_v45  ;;  %6053 = vmatpush3.bf16.msra.mxu0 %v6052_v46  ;;  %v5179_v46 = vld [vmem:[%s7512_s12] ss:$0 sm:$0xff] }
 0x76f   : > { %5652 = vmatprep.subr.mxu1 %v6561_v0  ;;  %5657 = vmatprep.subr.mxu0 %v6561_v0 }
 0x771   : > { %5639 = vmatmul.mubr.msk.f32.vlgmr.msra.gmra.mrb[18].mxu1 %vm780_vm3, %v7049_v38  ;;  %5650 = vmatmul.mubr.msk.f32.vlgmr.msra.gmra.mrb[16].mxu0 %vm780_vm3, %v7049_v38 }
 0x772   : > { %5654 = vmatprep.mubr.msk.f32.mxu1 %vm6562_vm0, %v6561_v0  ;;  %5659 = vmatprep.mubr.msk.f32.mxu0 %vm6562_vm0, %v6561_v0 }
 0x834   : > { %v1792_v47 = vpop.f32.mrb[14].mxu1  ;;  %v1862_v48 = vpop.f32.mrb[12].mxu0 }
 0x835   : > { %v5596_v49 = vpop.f32.mrb[15].mxu1  ;;  %v5607_v50 = vpop.f32.mrb[13].mxu0 }
 0x83c   : > { %v1951_v51 = vpop.f32.mrb[16].mxu1  ;;  %v2021_v52 = vpop.f32.mrb[14].mxu0 }
 0x83d   : > { %v5618_v53 = vpop.f32.mrb[17].mxu1  ;;  %v5629_v54 = vpop.f32.mrb[15].mxu0  ;;  %5653 = vmatpush3.xpose.msk.msra.mxu1 %vm780_vm3, %v1951_v51  ;;  %5658 = vmatpush3.xpose.msk.msra.mxu0 %vm780_vm3, %v2021_v52 }
 0x83e   : > { %5662 = vmatprep.subr.mxu1 %v6561_v0  ;;  %5667 = vmatprep.subr.mxu0 %v6561_v0 }
 0x840   : > { %5655 = vmatmul.mubr.msk.f32.vlgmr.msra.gmra.mrb[20].mxu1 %vm780_vm3, %v1792_v47  ;;  %5660 = vmatmul.mubr.msk.f32.vlgmr.msra.gmra.mrb[18].mxu0 %vm780_vm3, %v1862_v48 }
 0x841   : > { %5664 = vmatprep.mubr.msk.f32.mxu1 %vm6562_vm0, %v6561_v0  ;;  %5669 = vmatprep.mubr.msk.f32.mxu0 %vm6562_vm0, %v6561_v0 }
 0x844   : > { %v2091_v55 = vpop.f32.mrb[18].mxu1  ;;  %v2161_v56 = vpop.f32.mrb[16].mxu0 }
 0x845   : > { %v5640_v57 = vpop.f32.mrb[19].mxu1  ;;  %v5651_v58 = vpop.f32.mrb[17].mxu0  ;;  %5663 = vmatpush3.msra.mxu1 %v2091_v55  ;;  %5668 = vmatpush3.msra.mxu0 %v2161_v56 }
 0x846   : > { %6054 = vmatprep.subr.bf16.mxu1 %v6563_v1  ;;  %6060 = vmatprep.subr.bf16.mxu0 %v6563_v1  ;;  %v2674_v58 = vld [vmem:[#allocation10] sm:$0xff] }
 0x913   : > { %v2246_v59 = vpop.f32.mrb[20].mxu1  ;;  %v2322_v60 = vpop.f32.mrb[18].mxu0 }
 0x914   : > { %v5656_v62 = vpop.f32.mrb[21].mxu1  ;;  %v5661_v63 = vpop.f32.mrb[19].mxu0  ;;  %v2326_v29 = vsel %vm1365_vm5, %v2246_v59, -inf  ;;  %v2329_v2 = vsel %vm1365_vm5, %v2322_v60, -inf }
 0x915   : > { %2327 = vmax.xlane.f32.xlu0 %v2326_v29  ;;  %2330 = vmax.xlane.f32.xlu1 %v2329_v2  ;;  %v2676_v62 = vld [vmem:[#allocation10 + $0x10] sm:$0xff]  ;;  %v2677_v63 = vld [vmem:[#allocation10 + $0x18] sm:$0xff]  ;;  %v2760_v2 = vld [vmem:[%s7515_s15 + $0x8] sm:$0xff] }
 0x916   : > { %v6070_v29 = vpack.c.bf16 %v2677_v63, %v2676_v62  ;;  %v2864_v63 = vsub.s32 4, %v6981_v11 }
 0x9a2   : > { %v2328_v3 = vpop.xlane.xlu0 %2327  ;;  %v2331_v4 = vpop.xlane.xlu1 %2330 }
 0x9a3   : > { %v2332_v5 = vsub.f32 %v2246_v59, %v2328_v3  ;;  %v2333_v6 = vsub.f32 %v2322_v60, %v2331_v4  ;;  %v2675_v59 = vld [vmem:[#allocation10 + $0x8] sm:$0xff]  ;;  %v2761_v3 = vld [vmem:[%s7515_s15 + $0x10] sm:$0xff] }
 0x9a4   : > { %v6067_v60 = vpack.c.bf16 %v2675_v59, %v2674_v58 }
 0x9a5   : > { %v2334_v7 = vmul.f32 1.442695, %v2332_v5  ;;  %v2336_v8 = vmul.f32 1.442695, %v2333_v6  ;;  %v2762_v5 = vld [vmem:[%s7515_s15 + $0x18] sm:$0xff] }
 0x9a6   : > { %v6076_v6 = vpack.c.bf16 %v2762_v5, %v2761_v3  ;;  %v2879_v3 = vld [vmem:[#allocation2 + $0xe0] sm:$0xff] }
 0x9a7   : > { %6304 = vpow2.f32 %v2334_v7  ;;  %v2763_v7 = vld [vmem:[%s7515_s15 + $0x20] sm:$0xff] }
 0x9a8   : > { %6306 = vpow2.f32 %v2336_v8  ;;  %v2764_v8 = vld [vmem:[%s7515_s15 + $0x28] sm:$0xff] }
 0x9b1   : > { %v6305_v9 = vpop.eup %6304 }
 0x9b2   : > { %v6307_v10 = vpop.eup %6306  ;;  %v2338_v15 = vsel %vm1365_vm5, %v6305_v9, 0.0 }
 0x9b3   : > { %2339 = vadd.xlane.f32.xlu0 %v2338_v15  ;;  %v2341_v16 = vsel %vm1365_vm5, %v6307_v10, 0.0 }
 0x9b4   : > { %2342 = vadd.xlane.f32.xlu1 %v2341_v16 }
 0xa40   : > { %v2340_v17 = vpop.xlane.xlu0 %2339 }
 0xa41   : > { %6308 = vrcp.f32 %v2340_v17  ;;  %v2343_v18 = vpop.xlane.xlu1 %2342  ;;  %v2666_v17 = vsub.s32 2, %v6981_v11 }
 0xa42   : > { %6310 = vrcp.f32 %v2343_v18  ;;  %v2671_v18 = vsub.s32 3, %v6981_v11 }
 0xa43   : > { %v2667_v19 = vrot.slane %v6987_v13, %v2666_v17 }
 0xa44   : > { %v2672_v22 = vrot.slane %v6987_v13, %v2671_v18 }
 0xa4b   : > { %v6309_v23 = vpop.eup %6308 }
 0xa4c   : > { %v6311_v25 = vpop.eup %6310  ;;  %v2345_v26 = vmul.f32 %v6309_v23, %v6305_v9  ;;  %v6079_v9 = vpack.c.bf16 %v2764_v8, %v2763_v7  ;;  %v2891_v7 = vld [vmem:[#allocation2 + $0x140] sm:$0xff]  ;;  %v2892_v8 = vld [vmem:[#allocation2 + $0x148] sm:$0xff] }
 0xa4d   : > { %v2347_v32 = vmul.f32 %v6311_v25, %v6307_v10  ;;  %v2765_v25 = vld [vmem:[%s7515_s15 + $0x30] sm:$0xff] }
 0xa4e   : > { %5665 = vmatmul.mubr.msk.f32.vlgmr.msra.gmra.mrb[22].mxu1 %vm1365_vm5, %v2345_v26  ;;  %v2766_v26 = vld [vmem:[%s7515_s15 + $0x38] sm:$0xff] }
 0xa4f   : > { %5670 = vmatmul.mubr.msk.f32.vlgmr.msra.gmra.mrb[20].mxu0 %vm1365_vm5, %v2347_v32  ;;  %6056 = vmatpush3.bf16.msra.mxu1 %v6055_v24 }
 0xa50   : > { %6062 = vmatpush3.bf16.msra.mxu0 %v6061_v28  ;;  %6057 = vmatprep.subr.bf16.mxu1 %v6563_v1  ;;  %v6082_v28 = vpack.c.bf16 %v2766_v26, %v2765_v25  ;;  %v2888_v25 = vld [vmem:[#allocation2 + $0x128] sm:$0xff] }
 0xa51   : > { %6063 = vmatprep.subr.bf16.mxu0 %v6563_v1  ;;  %5680 = vmatprep.mubr.msk.f32.mxu1 %vm6562_vm0, %v6561_v0 }
 0xa52   : > { %5691 = vmatprep.mubr.msk.f32.mxu0 %vm6562_vm0, %v6561_v0 }
 0xa53   : > { %6059 = vmatpush3.bf16.msra.mxu1 %v6058_v35  ;;  %v5182_v35 = vld [vmem:[%s7566_s25] ss:$0 sm:$0xff] }
 0xa54   : > { %6065 = vmatpush3.bf16.msra.mxu0 %v6064_v36  ;;  %6066 = vmatprep.subr.bf16.mxu1 %v6563_v1 }
 0xa55   : > { %6072 = vmatprep.subr.bf16.mxu0 %v6563_v1 }
 0xb21   : > { %v2417_v37 = vpop.f32.mrb[22].mxu1 }
 0xb22   : > { %v2490_v39 = vpop.f32.mrb[20].mxu0  ;;  %v5666_v40 = vpop.f32.mrb[23].mxu1  ;;  %5681 = vmatmul.mubr.msk.f32.vlgmr.msra.gmra.mrb[24].mxu1 %vm780_vm3, %v2417_v37 }
 0xb23   : > { %v5671_v41 = vpop.f32.mrb[21].mxu0  ;;  %5692 = vmatmul.mubr.msk.f32.vlgmr.msra.gmra.mrb[22].mxu0 %vm780_vm3, %v2490_v39  ;;  %5702 = vmatprep.mubr.msk.f32.mxu1 %vm6562_vm0, %v6561_v0 }
 0xb24   : > { %5721 = vmatprep.mubr.msk.f32.mxu0 %vm6562_vm0, %v6561_v0  ;;  %6068 = vmatpush3.bf16.msra.mxu1 %v6067_v60 }
 0xb25   : > { %6069 = vmatprep.subr.bf16.mxu1 %v6563_v1 }
 0xb28   : > { %6071 = vmatpush3.bf16.msra.mxu1 %v6070_v29  ;;  %v2869_v29 = vsub.s32 5, %v6981_v11 }
 0xb29   : > { %6084 = vmatprep.subr.bf16.mxu1 %v6563_v1 }
 0xbf5   : > { %v2563_v42 = vpop.f32.mrb[24].mxu1 }
 0xbf6   : > { %v2640_v43 = vsel %vm780_vm3, %v2563_v42, 0.0  ;;  %v2636_v44 = vpop.f32.mrb[22].mxu0  ;;  %v5682_v45 = vpop.f32.mrb[25].mxu1 }
 0xbf7   : > { %v2641_v47 = vsel %vm780_vm3, %v2636_v44, 0.0  ;;  %v5693_v48 = vpop.f32.mrb[23].mxu0 }
 0xbf8   : > { %v2642_v49 = vadd.f32 %v2641_v47, %v2640_v43  ;;  %v2875_v47 = vld [vmem:[#allocation2 + $0xc0] sm:$0xff]  ;;  %v2876_v48 = vld [vmem:[#allocation2 + $0xc8] sm:$0xff] }
 0xbfa   : > { %v2649_v50 = vadd.f32 %v5179_v46, %v2642_v49  ;;  %v2883_v49 = vld [vmem:[#allocation2 + $0x100] sm:$0xff] }
 0xbfc   : > { %v2650_v51 = vadd.f32 %v2649_v50, %v7011_v27  ;;  %v2759_v27 = vld [vmem:[%s7515_s15] sm:$0xff]  ;;  %v6085_v50 = vpack.c.bf16 %v2876_v48, %v2875_v47 }
 0xbfd   : > { %v6073_v4 = vpack.c.bf16 %v2760_v2, %v2759_v27  ;;  %v2865_v27 = vrot.slane %v6987_v13, %v2864_v63 }
 0xbfe   : > { %v2651_v52 = vsel %vm780_vm3, %v2650_v51, 0.0 }
 0xbff   : > { %2652 = vadd.xlane.f32.xlu0 %v2651_v52  ;;  %6074 = vmatpush3.bf16.msra.mxu0 %v6073_v4  ;;  %v2870_v4 = vrot.slane %v6987_v13, %v2869_v29 }
 0xc00   : > { %6075 = vmatprep.subr.bf16.mxu0 %v6563_v1 }
 0xc03   : > { %6077 = vmatpush3.bf16.msra.mxu0 %v6076_v6  ;;  %v2880_v6 = vld [vmem:[#allocation2 + $0xe8] sm:$0xff] }
 0xc04   : > { %6078 = vmatprep.subr.bf16.mxu0 %v6563_v1 }
 0xc07   : > { %6080 = vmatpush3.bf16.msra.mxu0 %v6079_v9 }
 0xc08   : > { %6081 = vmatprep.subr.bf16.mxu0 %v6563_v1 }
 0xc0b   : > { %6083 = vmatpush3.bf16.msra.mxu0 %v6082_v28  ;;  %v2889_v28 = vld [vmem:[#allocation2 + $0x130] sm:$0xff] }
 0xc0c   : > { %6096 = vmatprep.subr.bf16.mxu0 %v6563_v1 }
 0xc8c   : > { %v2653_v53 = vpop.xlane.xlu0 %2652 }
 0xc8d   : > { %v2654_v54 = vmul.f32 0.03125, %v2653_v53  ;;  %v2877_v53 = vld [vmem:[#allocation2 + $0xd0] sm:$0xff] }
 0xc8f   : > { %v2655_v55 = vsub.f32 %v2650_v51, %v2654_v54  ;;  %v2884_v51 = vld [vmem:[#allocation2 + $0x108] sm:$0xff]  ;;  %v2878_v54 = vld [vmem:[#allocation2 + $0xd8] sm:$0xff] }
 0xc90   : > { %v6097_v52 = vpack.c.bf16 %v2884_v51, %v2883_v49 }
 0xc91   : > { %v2656_v56 = vmul.f32 %v2655_v55, %v2655_v55 }
 0xc93   : > { %v2657_v57 = vsel %vm780_vm3, %v2656_v56, 0.0  ;;  %v6088_v56 = vpack.c.bf16 %v2878_v54, %v2877_v53 }
 0xc94   : > { %2658 = vadd.xlane.f32.xlu1 %v2657_v57  ;;  %v2886_v57 = vld [vmem:[#allocation2 + $0x118] sm:$0xff] }
 0xd21   : > { %v2659_v10 = vpop.xlane.xlu1 %2658 }
 0xd22   : > { %v2660_v15 = vmul.f32 0.03125, %v2659_v10  ;;  %v6091_v10 = vpack.c.bf16 %v2880_v6, %v2879_v3 }
 0xd24   : > { %v2661_v16 = vadd.f32 1e-05, %v2660_v15  ;;  %v6109_v15 = vpack.c.bf16 %v2892_v8, %v2891_v7  ;;  %v3323_v8 = vld [vmem:[#allocation5 + $0x40] sm:$0xff] }
 0xd26   : > { %6312 = vrsqrt.f32 %v2661_v16  ;;  %v2881_v16 = vld [vmem:[#allocation2 + $0xf0] sm:$0xff] }
 0xd30   : > { %v6313_v20 = vpop.eup %6312 }
 0xd31   : > { %v2663_v21 = vmul.f32 %v6313_v20, %v2655_v55  ;;  %v2885_v55 = vld [vmem:[#allocation2 + $0x110] sm:$0xff]  ;;  %v2882_v20 = vld [vmem:[#allocation2 + $0xf8] sm:$0xff] }
 0xd32   : > { %v6100_v58 = vpack.c.bf16 %v2886_v57, %v2885_v55  ;;  %v6094_v13 = vpack.c.bf16 %v2882_v20, %v2881_v16  ;;  %v3325_v20 = vld [vmem:[#allocation5 + $0x50] sm:$0xff] }
 0xd33   : > { %v2668_v23 = vmul.f32 %v2667_v19, %v2663_v21  ;;  %v2893_v21 = vld [vmem:[#allocation2 + $0x150] sm:$0xff] }
 0xd35   : > { %v2673_v24 = vadd.f32 %v2672_v22, %v2668_v23  ;;  %v2894_v22 = vld [vmem:[#allocation2 + $0x158] sm:$0xff] }
 0xd36   : > { %v6112_v23 = vpack.c.bf16 %v2894_v22, %v2893_v21  ;;  %v3326_v21 = vld [vmem:[#allocation5 + $0x58] sm:$0xff] }
 0xd37   : > { %5703 = vmatmul.mubr.msk.f32.vlgmr.msra.gmra.mrb[26].mxu1 %vm780_vm3, %v2673_v24  ;;  %v6124_v22 = vpack.c.bf16 %v3326_v21, %v3325_v20  ;;  %v5207_v20 = vld [vmem:[%s7510_s10 + $0xa0] sm:$0xff] }
 0xd38   : > { %5732 = vmatprep.mubr.msk.f32.mxu1 %vm6562_vm0, %v6561_v0  ;;  %6086 = vmatpush3.bf16.msra.mxu1 %v6085_v50 }
 0xd39   : > { %6087 = vmatprep.subr.bf16.mxu1 %v6563_v1 }
 0xd3c   : > { %6089 = vmatpush3.bf16.msra.mxu1 %v6088_v56 }
 0xd3d   : > { %6090 = vmatprep.subr.bf16.mxu1 %v6563_v1 }
 0xe0a   : > { %v2754_v31 = vpop.f32.mrb[26].mxu1 }
 0xe0b   : > { %v2755_v32 = vadd.f32 %v5180_v30, %v2754_v31  ;;  %v5704_v33 = vpop.f32.mrb[27].mxu1  ;;  %v2890_v30 = vld [vmem:[#allocation2 + $0x138] sm:$0xff] }
 0xe0c   : > { %v6106_v31 = vpack.c.bf16 %v2890_v30, %v2889_v28  ;;  %v2896_v33 = vld [vmem:[#allocation2 + $0x168] sm:$0xff]  ;;  %v3329_v28 = vld [vmem:[#allocation5 + $0x70] sm:$0xff] }
 0xe0d   : > { %v2758_v34 = vmax.f32 %v2755_v32, 0.0  ;;  %v2895_v32 = vld [vmem:[#allocation2 + $0x160] sm:$0xff] }
 0xe0f   : > { %5722 = vmatmul.mubr.msk.f32.vlgmr.msra.gmra.mrb[24].mxu0 %vm2774_vm6, %v2758_v34  ;;  %v6115_v34 = vpack.c.bf16 %v2896_v33, %v2895_v32 }
 0xe10   : > { %5754 = vmatprep.mubr.msk.f32.mxu0 %vm6562_vm0, %v6561_v0  ;;  %6098 = vmatpush3.bf16.msra.mxu0 %v6097_v52 }
 0xe11   : > { %6099 = vmatprep.subr.bf16.mxu0 %v6563_v1 }
 0xe14   : > { %6101 = vmatpush3.bf16.msra.mxu0 %v6100_v58 }
 0xe15   : > { %6108 = vmatprep.subr.bf16.mxu0 %v6563_v1 }
 0xee2   : > { %v2844_v36 = vpop.f32.mrb[24].mxu0 }
 0xee3   : > { %v2845_v37 = vadd.f32 %v5182_v35, %v2844_v36  ;;  %v5723_v39 = vpop.f32.mrb[25].mxu0  ;;  %v2897_v35 = vld [vmem:[#allocation2 + $0x170] sm:$0xff]  ;;  %v2898_v36 = vld [vmem:[#allocation2 + $0x178] sm:$0xff] }
 0xee5   : > { %v2848_v40 = vadd.f32 %v2845_v37, %v2673_v24  ;;  %v2887_v24 = vld [vmem:[#allocation2 + $0x120] sm:$0xff]  ;;  %v6118_v37 = vpack.c.bf16 %v2898_v36, %v2897_v35 }
 0xee6   : > { %v6103_v26 = vpack.c.bf16 %v2888_v25, %v2887_v24  ;;  %v3327_v25 = vld [vmem:[#allocation5 + $0x60] sm:$0xff] }
 0xee7   : > { %v2849_v41 = vsel %vm780_vm3, %v2848_v40, 0.0 }
 0xee8   : > { %2850 = vadd.xlane.f32.xlu0 %v2849_v41 }
 0xf75   : > { %v2851_v42 = vpop.xlane.xlu0 %2850 }
 0xf76   : > { %v2852_v43 = vmul.f32 0.03125, %v2851_v42 }
 0xf78   : > { %v2853_v44 = vsub.f32 %v2848_v40, %v2852_v43 }
 0xf7a   : > { %v2854_v45 = vmul.f32 %v2853_v44, %v2853_v44 }
 0xf7c   : > { %v2855_v46 = vsel %vm780_vm3, %v2854_v45, 0.0 }
 0xf7d   : > { %2856 = vadd.xlane.f32.xlu1 %v2855_v46 }
0x100a   : > { %v2857_v59 = vpop.xlane.xlu1 %2856 }
0x100b   : > { %v2858_v60 = vmul.f32 0.03125, %v2857_v59 }
0x100d   : > { %v2859_v62 = vadd.f32 1e-05, %v2858_v60 }
0x100f   : > { %6314 = vrsqrt.f32 %v2859_v62 }
0x1019   : > { %v6315_v2 = vpop.eup %6314 }
0x101a   : > { %v2861_v5 = vmul.f32 %v6315_v2, %v2853_v44 }
0x101c   : > { %v2866_v9 = vmul.f32 %v2865_v27, %v2861_v5 }
0x101e   : > { %v7189_v19 = vadd.f32 %v2870_v4, %v2866_v9  ;;  %v3324_v9 = vld [vmem:[#allocation5 + $0x48] sm:$0xff] }
0x1020   : > { %5733 = vmatmul.mubr.msk.f32.vlgmr.msra.gmra.mrb[28].mxu1 %vm780_vm3, %v7189_v19  ;;  %5755 = vmatmul.mubr.msk.f32.vlgmr.msra.gmra.mrb[26].mxu0 %vm780_vm3, %v7189_v19 }
0x1021   : > { %6092 = vmatpush3.bf16.msra.mxu1 %v6091_v10  ;;  %6110 = vmatpush3.bf16.msra.mxu0 %v6109_v15  ;;  %v6121_v15 = vpack.c.bf16 %v3324_v9, %v3323_v8  ;;  %v5203_v9 = vld [vmem:[%s7510_s10 + $0x80] sm:$0xff] }
0x1022   : > { %6093 = vmatprep.subr.bf16.mxu1 %v6563_v1  ;;  %6111 = vmatprep.subr.bf16.mxu0 %v6563_v1 }
0x1023   : > { %5743 = vmatprep.mubr.msk.f32.mxu1 %vm6562_vm0, %v6561_v0  ;;  %5776 = vmatprep.mubr.msk.f32.mxu0 %vm6562_vm0, %v6561_v0 }
0x1025   : > { %6095 = vmatpush3.bf16.msra.mxu1 %v6094_v13  ;;  %6113 = vmatpush3.bf16.msra.mxu0 %v6112_v23 }
0x1026   : > { %6102 = vmatprep.subr.bf16.mxu1 %v6563_v1  ;;  %5790 = vmatprep.subr.mxu0 %v6561_v0 }
0x1028   : > { %5744 = vmatmul.mubr.msk.f32.vlgmr.msra.gmra.mrb[30].mxu1 %vm780_vm3, %v7189_v19  ;;  %5777 = vmatmul.mubr.msk.f32.vlgmr.msra.gmra.mrb[28].mxu0 %vm780_vm3, %v7189_v19 }
0x1029   : > { %6104 = vmatpush3.bf16.msra.mxu1 %v6103_v26  ;;  %5765 = vmatprep.mubr.msk.f32.mxu1 %vm6562_vm0, %v6561_v0  ;;  %v3328_v26 = vld [vmem:[#allocation5 + $0x68] sm:$0xff] }
0x102a   : > { %6105 = vmatprep.subr.bf16.mxu1 %v6563_v1  ;;  %5792 = vmatprep.mubr.msk.f32.mxu0 %vm6562_vm0, %v6561_v0  ;;  %v6127_v30 = vpack.c.bf16 %v3328_v26, %v3327_v25  ;;  %v5209_v25 = vld [vmem:[%s7510_s10 + $0xb0] sm:$0xff]  ;;  %v5210_v26 = vld [vmem:[%s7510_s10 + $0xb8] sm:$0xff] }
0x102d   : > { %6107 = vmatpush3.bf16.msra.mxu1 %v6106_v31  ;;  %v3330_v31 = vld [vmem:[#allocation5 + $0x78] sm:$0xff] }
0x102e   : > { %6114 = vmatprep.subr.bf16.mxu1 %v6563_v1  ;;  %v6130_v32 = vpack.c.bf16 %v3330_v31, %v3329_v28  ;;  %v5211_v31 = vld [vmem:[%s7510_s10 + $0xc0] sm:$0xff] }
0x1030   : > { %5766 = vmatmul.mubr.msk.f32.vlgmr.msra.gmra.mrb[32].mxu1 %vm780_vm3, %v7189_v19 }
0x1031   : > { %6116 = vmatpush3.bf16.msra.mxu1 %v6115_v34  ;;  %5787 = vmatprep.mubr.msk.f32.mxu1 %vm6562_vm0, %v6561_v0 }
0x1032   : > { %6117 = vmatprep.subr.bf16.mxu1 %v6563_v1 }
0x1035   : > { %6119 = vmatpush3.bf16.msra.mxu1 %v6118_v37 }
0x1036   : > { %5800 = vmatprep.subr.mxu1 %v6561_v0 }
0x1038   : > { %5788 = vmatmul.mubr.msk.f32.vlgmr.msra.gmra.mrb[34].mxu1 %vm780_vm3, %v7189_v19 }
0x1039   : > { %5802 = vmatprep.mubr.msk.f32.mxu1 %vm6562_vm0, %v6561_v0 }
0x10f3   : > { %v2968_v39 = vpop.f32.mrb[28].mxu1  ;;  %v3108_v40 = vpop.f32.mrb[26].mxu0 }
0x10f4   : > { %v5734_v41 = vpop.f32.mrb[29].mxu1  ;;  %v5756_v42 = vpop.f32.mrb[27].mxu0  ;;  %5791 = vmatpush3.xpose.msk.msra.mxu0 %vm780_vm3, %v3108_v40 }
0x10f5   : > { %5795 = vmatprep.subr.mxu0 %v6561_v0  ;;  %v5200_v42 = vld [vmem:[%s7508_s8 + $0x1] ss:$0 sm:$0xff] }
0x10f7   : > { %5793 = vmatmul.mubr.msk.f32.vlgmr.msra.gmra.mrb[30].mxu0 %vm780_vm3, %v2968_v39 }
0x10f8   : > { %5797 = vmatprep.mubr.msk.f32.mxu0 %vm6562_vm0, %v6561_v0 }
0x10fb   : > { %v3038_v43 = vpop.f32.mrb[30].mxu1  ;;  %v3248_v44 = vpop.f32.mrb[28].mxu0 }
0x10fc   : > { %v5745_v45 = vpop.f32.mrb[31].mxu1  ;;  %v5778_v46 = vpop.f32.mrb[29].mxu0  ;;  %5801 = vmatpush3.msra.mxu1 %v3248_v44 }
0x10fd   : > { %6120 = vmatprep.subr.bf16.mxu1 %v6563_v1 }
0x1103   : > { %v3178_v47 = vpop.f32.mrb[32].mxu1 }
0x1104   : > { %v5767_v48 = vpop.f32.mrb[33].mxu1  ;;  %5796 = vmatpush3.xpose.msk.msra.mxu0 %vm780_vm3, %v3178_v47 }
0x1105   : > { %5805 = vmatprep.subr.mxu0 %v6561_v0 }
0x1107   : > { %5798 = vmatmul.mubr.msk.f32.vlgmr.msra.gmra.mrb[32].mxu0 %vm780_vm3, %v3038_v43 }
0x1108   : > { %5807 = vmatprep.mubr.msk.f32.mxu0 %vm6562_vm0, %v6561_v0 }
0x110b   : > { %v3318_v49 = vpop.f32.mrb[34].mxu1 }
0x110c   : > { %v5789_v50 = vpop.f32.mrb[35].mxu1  ;;  %5806 = vmatpush3.msra.mxu0 %v3318_v49 }
0x110d   : > { %6126 = vmatprep.subr.bf16.mxu0 %v6563_v1 }
0x11ca   : > { %v3405_v51 = vpop.f32.mrb[30].mxu0 }
0x11cb   : > { %v3406_v52 = vadd.f32 %v3405_v51, %v6945_v61  ;;  %v5794_v53 = vpop.f32.mrb[31].mxu0 }
0x11cd   : > { %v3485_v54 = vsel %vm1365_vm5, %v3406_v52, -inf }
0x11ce   : > { %3486 = vmax.xlane.f32.xlu0 %v3485_v54  ;;  %v3834_v54 = vld [vmem:[#allocation7 + $0x40] sm:$0xff] }
0x11da   : > { %v3481_v55 = vpop.f32.mrb[32].mxu0 }
0x11db   : > { %v3482_v56 = vadd.f32 %v3481_v55, %v6945_v61  ;;  %v5799_v57 = vpop.f32.mrb[33].mxu0  ;;  %v3835_v55 = vld [vmem:[#allocation7 + $0x48] sm:$0xff] }
0x11dc   : > { %v6133_v57 = vpack.c.bf16 %v3835_v55, %v3834_v54 }
0x11dd   : > { %v3488_v58 = vsel %vm1365_vm5, %v3482_v56, -inf }
0x11de   : > { %3489 = vmax.xlane.f32.xlu1 %v3488_v58  ;;  %v3839_v58 = vld [vmem:[#allocation7 + $0x68] sm:$0xff] }
0x125b   : > { %v3487_v59 = vpop.xlane.xlu0 %3486 }
0x125c   : > { %v3491_v60 = vsub.f32 %v3406_v52, %v3487_v59 }
0x125e   : > { %v3493_v62 = vmul.f32 1.442695, %v3491_v60  ;;  %v3837_v60 = vld [vmem:[#allocation7 + $0x58] sm:$0xff] }
0x1260   : > { %6316 = vpow2.f32 %v3493_v62  ;;  %v3840_v62 = vld [vmem:[#allocation7 + $0x70] sm:$0xff] }
0x126a   : > { %v6317_v27 = vpop.eup %6316 }
0x126b   : > { %v3490_v2 = vpop.xlane.xlu1 %3489  ;;  %v3497_v3 = vsel %vm1365_vm5, %v6317_v27, 0.0 }
0x126c   : > { %v3492_v4 = vsub.f32 %v3482_v56, %v3490_v2  ;;  %3498 = vadd.xlane.f32.xlu0 %v3497_v3  ;;  %v3838_v56 = vld [vmem:[#allocation7 + $0x60] sm:$0xff]  ;;  %v3841_v2 = vld [vmem:[#allocation7 + $0x78] sm:$0xff] }
0x126d   : > { %v6139_v59 = vpack.c.bf16 %v3839_v58, %v3838_v56  ;;  %v6142_v3 = vpack.c.bf16 %v3841_v2, %v3840_v62 }
0x126e   : > { %v3495_v5 = vmul.f32 1.442695, %v3492_v4 }
0x1270   : > { %6318 = vpow2.f32 %v3495_v5 }
0x127a   : > { %v6319_v6 = vpop.eup %6318 }
0x127b   : > { %v3500_v7 = vsel %vm1365_vm5, %v6319_v6, 0.0 }
0x127c   : > { %3501 = vadd.xlane.f32.xlu1 %v3500_v7  ;;  %v7272_v7 = vld [vmem:[%s7517_s17 + $0x8] sm:$0x3f] }
0x12f9   : > { %v3499_v61 = vpop.xlane.xlu0 %3498 }
0x12fa   : > { %6320 = vrcp.f32 %v3499_v61  ;;  %v3826_v61 = vrot.slane %v7272_v7, %v1707_v12  ;;  %v5208_v12 = vld [vmem:[%s7510_s10 + $0xa8] sm:$0xff] }
0x1304   : > { %v6321_v10 = vpop.eup %6320 }
0x1305   : > { %v3504_v16 = vmul.f32 %v6321_v10, %v6317_v27 }
0x1307   : > { %5803 = vmatmul.mubr.msk.f32.vlgmr.msra.gmra.mrb[36].mxu1 %vm1365_vm5, %v3504_v16  ;;  %v5204_v16 = vld [vmem:[%s7510_s10 + $0x88] sm:$0xff] }
0x1308   : > { %6122 = vmatpush3.bf16.msra.mxu1 %v6121_v15  ;;  %5818 = vmatprep.mubr.msk.f32.mxu1 %vm6562_vm0, %v6561_v0  ;;  %v3831_v15 = vrot.slane %v7272_v7, %v1712_v14 }
0x1309   : > { %v3502_v13 = vpop.xlane.xlu1 %3501  ;;  %6123 = vmatprep.subr.bf16.mxu1 %v6563_v1 }
0x130a   : > { %6322 = vrcp.f32 %v3502_v13  ;;  %v6151_v13 = vpack.c.bf16 %v5208_v12, %v5207_v20  ;;  %v4287_v20 = vld [vmem:[#allocation8 + $0x60] sm:$0xff]  ;;  %v4288_v12 = vld [vmem:[#allocation8 + $0x68] sm:$0xff] }
0x130c   : > { %6125 = vmatpush3.bf16.msra.mxu1 %v6124_v22  ;;  %v6145_v22 = vpack.c.bf16 %v5204_v16, %v5203_v9  ;;  %v4284_v16 = vld [vmem:[#allocation8 + $0x48] sm:$0xff] }
0x130d   : > { %6132 = vmatprep.subr.bf16.mxu1 %v6563_v1 }
0x1314   : > { %v6323_v23 = vpop.eup %6322 }
0x1315   : > { %v3506_v24 = vmul.f32 %v6323_v23, %v6319_v6  ;;  %v5205_v23 = vld [vmem:[%s7510_s10 + $0x90] sm:$0xff] }
0x1317   : > { %5808 = vmatmul.mubr.msk.f32.vlgmr.msra.gmra.mrb[34].mxu0 %vm1365_vm5, %v3506_v24  ;;  %v5206_v24 = vld [vmem:[%s7510_s10 + $0x98] sm:$0xff] }
0x1318   : > { %5829 = vmatprep.mubr.msk.f32.mxu0 %vm6562_vm0, %v6561_v0  ;;  %6128 = vmatpush3.bf16.msra.mxu0 %v6127_v30  ;;  %v6148_v28 = vpack.c.bf16 %v5206_v24, %v5205_v23  ;;  %v6154_v30 = vpack.c.bf16 %v5210_v26, %v5209_v25  ;;  %v6175_v24 = vpack.c.bf16 %v4288_v12, %v4287_v20  ;;  %v4285_v25 = vld [vmem:[#allocation8 + $0x50] sm:$0xff]  ;;  %v4286_v26 = vld [vmem:[#allocation8 + $0x58] sm:$0xff] }
0x1319   : > { %6129 = vmatprep.subr.bf16.mxu0 %v6563_v1  ;;  %v5243_v12 = vld [vmem:[%s7515_s15 + $0x78] sm:$0xff] }
0x131c   : > { %6131 = vmatpush3.bf16.msra.mxu0 %v6130_v32  ;;  %v5212_v32 = vld [vmem:[%s7510_s10 + $0xc8] sm:$0xff] }
0x131d   : > { %6138 = vmatprep.subr.bf16.mxu0 %v6563_v1 }
0x13da   : > { %v3576_v33 = vpop.f32.mrb[36].mxu1 }
0x13db   : > { %v5804_v34 = vpop.f32.mrb[37].mxu1  ;;  %5819 = vmatmul.mubr.msk.f32.vlgmr.msra.gmra.mrb[38].mxu1 %vm780_vm3, %v3576_v33  ;;  %v5215_v33 = vld [vmem:[%s7510_s10 + $0xe0] sm:$0xff] }
0x13dc   : > { %5840 = vmatprep.mubr.msk.f32.mxu1 %vm6562_vm0, %v6561_v0  ;;  %6134 = vmatpush3.bf16.msra.mxu1 %v6133_v57  ;;  %v5216_v34 = vld [vmem:[%s7510_s10 + $0xe8] sm:$0xff] }
0x13dd   : > { %6135 = vmatprep.subr.bf16.mxu1 %v6563_v1 }
0x13ea   : > { %v3649_v35 = vpop.f32.mrb[34].mxu0 }
0x13eb   : > { %v5809_v36 = vpop.f32.mrb[35].mxu0  ;;  %5830 = vmatmul.mubr.msk.f32.vlgmr.msra.gmra.mrb[36].mxu0 %vm780_vm3, %v3649_v35  ;;  %v6157_v35 = vpack.c.bf16 %v5212_v32, %v5211_v31  ;;  %v4290_v31 = vld [vmem:[#allocation8 + $0x78] sm:$0xff]  ;;  %v6172_v32 = vpack.c.bf16 %v4286_v26, %v4285_v25 }
0x13ec   : > { %5851 = vmatprep.mubr.msk.f32.mxu0 %vm6562_vm0, %v6561_v0  ;;  %6140 = vmatpush3.bf16.msra.mxu0 %v6139_v59  ;;  %v6163_v36 = vpack.c.bf16 %v5216_v34, %v5215_v33 }
0x13ed   : > { %6141 = vmatprep.subr.bf16.mxu0 %v6563_v1 }
0x13f0   : > { %6143 = vmatpush3.bf16.msra.mxu0 %v6142_v3 }
0x13f1   : > { %6150 = vmatprep.subr.bf16.mxu0 %v6563_v1 }
0x14ae   : > { %v3722_v37 = vpop.f32.mrb[38].mxu1 }
0x14af   : > { %v5820_v39 = vpop.f32.mrb[39].mxu1  ;;  %v3799_v41 = vsel %vm780_vm3, %v3722_v37, 0.0  ;;  %v5213_v37 = vld [vmem:[%s7510_s10 + $0xd0] sm:$0xff] }
0x14b0   : > { %v5214_v39 = vld [vmem:[%s7510_s10 + $0xd8] sm:$0xff] }
0x14be   : > { %v3795_v40 = vpop.f32.mrb[36].mxu0 }
0x14bf   : > { %v3800_v43 = vsel %vm780_vm3, %v3795_v40, 0.0  ;;  %v5831_v44 = vpop.f32.mrb[37].mxu0  ;;  %v5217_v40 = vld [vmem:[%s7510_s10 + $0xf0] sm:$0xff] }
0x14c0   : > { %v3801_v45 = vadd.f32 %v3800_v43, %v3799_v41  ;;  %v5218_v41 = vld [vmem:[%s7510_s10 + $0xf8] sm:$0xff] }
0x14c1   : > { %v6166_v43 = vpack.c.bf16 %v5218_v41, %v5217_v40 }
0x14c2   : > { %v3808_v46 = vadd.f32 %v5200_v42, %v3801_v45  ;;  %v6160_v42 = vpack.c.bf16 %v5214_v39, %v5213_v37 }
0x14c4   : > { %v3809_v47 = vadd.f32 %v3808_v46, %v7189_v19  ;;  %v3836_v19 = vld [vmem:[#allocation7 + $0x50] sm:$0xff] }
0x14c5   : > { %v6136_v27 = vpack.c.bf16 %v3837_v60, %v3836_v19 }
0x14c6   : > { %v3810_v48 = vsel %vm780_vm3, %v3809_v47, 0.0 }
0x14c7   : > { %3811 = vadd.xlane.f32.xlu0 %v3810_v48  ;;  %6137 = vmatpush3.bf16.msra.mxu1 %v6136_v27 }
0x14c8   : > { %6144 = vmatprep.subr.bf16.mxu1 %v6563_v1 }
0x1554   : > { %v3812_v49 = vpop.xlane.xlu0 %3811 }
0x1555   : > { %v3813_v50 = vmul.f32 0.03125, %v3812_v49 }
0x1557   : > { %v3814_v51 = vsub.f32 %v3809_v47, %v3813_v50 }
0x1559   : > { %v3815_v52 = vmul.f32 %v3814_v51, %v3814_v51 }
0x155b   : > { %v3816_v53 = vsel %vm780_vm3, %v3815_v52, 0.0 }
0x155c   : > { %3817 = vadd.xlane.f32.xlu1 %v3816_v53 }
0x15e9   : > { %v3818_v4 = vpop.xlane.xlu1 %3817 }
0x15ea   : > { %v3819_v5 = vmul.f32 0.03125, %v3818_v4 }
0x15ec   : > { %v3820_v6 = vadd.f32 1e-05, %v3819_v5 }
0x15ee   : > { %6324 = vrsqrt.f32 %v3820_v6 }
0x15f8   : > { %v6325_v8 = vpop.eup %6324 }
0x15f9   : > { %v3822_v10 = vmul.f32 %v6325_v8, %v3814_v51 }
0x15fb   : > { %v3827_v21 = vmul.f32 %v3826_v61, %v3822_v10 }
0x15fd   : > { %v7295_v14 = vadd.f32 %v3831_v15, %v3827_v21  ;;  %v4283_v15 = vld [vmem:[#allocation8 + $0x40] sm:$0xff] }
0x15ff   : > { %5841 = vmatmul.mubr.msk.f32.vlgmr.msra.gmra.mrb[40].mxu1 %vm780_vm3, %v7295_v14  ;;  %5852 = vmatmul.mubr.msk.f32.vlgmr.msra.gmra.mrb[38].mxu0 %vm780_vm3, %v7295_v14 }
0x1600   : > { %6146 = vmatpush3.bf16.msra.mxu1 %v6145_v22  ;;  %6152 = vmatpush3.bf16.msra.mxu0 %v6151_v13  ;;  %v6169_v22 = vpack.c.bf16 %v4284_v16, %v4283_v15  ;;  %v4791_v15 = vrot.slane %v7272_v7, %v2671_v18 }
0x1601   : > { %6147 = vmatprep.subr.bf16.mxu1 %v6563_v1  ;;  %6153 = vmatprep.subr.bf16.mxu0 %v6563_v1 }
0x1602   : > { %5862 = vmatprep.mubr.msk.f32.mxu1 %vm6562_vm0, %v6561_v0  ;;  %5873 = vmatprep.mubr.msk.f32.mxu0 %vm6562_vm0, %v6561_v0 }
0x1604   : > { %6149 = vmatpush3.bf16.msra.mxu1 %v6148_v28  ;;  %6155 = vmatpush3.bf16.msra.mxu0 %v6154_v30  ;;  %v4289_v30 = vld [vmem:[#allocation8 + $0x70] sm:$0xff] }
0x1605   : > { %6156 = vmatprep.subr.bf16.mxu1 %v6563_v1  ;;  %6162 = vmatprep.subr.bf16.mxu0 %v6563_v1  ;;  %v6178_v33 = vpack.c.bf16 %v4290_v31, %v4289_v30 }
0x1607   : > { %5863 = vmatmul.mubr.msk.f32.vlgmr.msra.gmra.mrb[42].mxu1 %vm780_vm3, %v7049_v38  ;;  %5874 = vmatmul.mubr.msk.f32.vlgmr.msra.gmra.mrb[40].mxu0 %vm780_vm3, %v7049_v38 }
0x1608   : > { %6158 = vmatpush3.bf16.msra.mxu1 %v6157_v35  ;;  %6164 = vmatpush3.bf16.msra.mxu0 %v6163_v36 }
0x1609   : > { %6159 = vmatprep.subr.bf16.mxu1 %v6563_v1  ;;  %6165 = vmatprep.subr.bf16.mxu0 %v6563_v1 }
0x160a   : > { %5884 = vmatprep.mubr.msk.f32.mxu1 %vm6562_vm0, %v6561_v0  ;;  %5895 = vmatprep.mubr.msk.f32.mxu0 %vm6562_vm0, %v6561_v0 }
0x160c   : > { %6161 = vmatpush3.bf16.msra.mxu1 %v6160_v42  ;;  %6167 = vmatpush3.bf16.msra.mxu0 %v6166_v43  ;;  %v5232_v43 = vld [vmem:[%s7512_s12 + $0x1] ss:$0 sm:$0xff] }
0x160d   : > { %5898 = vmatprep.subr.mxu1 %v6561_v0  ;;  %5903 = vmatprep.subr.mxu0 %v6561_v0 }
0x160f   : > { %5885 = vmatmul.mubr.msk.f32.vlgmr.msra.gmra.mrb[44].mxu1 %vm780_vm3, %v7049_v38  ;;  %5896 = vmatmul.mubr.msk.f32.vlgmr.msra.gmra.mrb[42].mxu0 %vm780_vm3, %v7049_v38 }
0x1610   : > { %5900 = vmatprep.mubr.msk.f32.mxu1 %vm6562_vm0, %v6561_v0  ;;  %5905 = vmatprep.mubr.msk.f32.mxu0 %vm6562_vm0, %v6561_v0 }
0x16d2   : > { %v3911_v44 = vpop.f32.mrb[40].mxu1  ;;  %v3981_v45 = vpop.f32.mrb[38].mxu0 }
0x16d3   : > { %v5842_v46 = vpop.f32.mrb[41].mxu1  ;;  %v5853_v47 = vpop.f32.mrb[39].mxu0 }
0x16da   : > { %v4068_v48 = vpop.f32.mrb[42].mxu1  ;;  %v4138_v49 = vpop.f32.mrb[40].mxu0 }
0x16db   : > { %v5864_v50 = vpop.f32.mrb[43].mxu1  ;;  %v5875_v51 = vpop.f32.mrb[41].mxu0  ;;  %5899 = vmatpush3.xpose.msk.msra.mxu1 %vm780_vm3, %v4068_v48  ;;  %5904 = vmatpush3.xpose.msk.msra.mxu0 %vm780_vm3, %v4138_v49 }
0x16dc   : > { %5908 = vmatprep.subr.mxu1 %v6561_v0  ;;  %5913 = vmatprep.subr.mxu0 %v6561_v0 }
0x16de   : > { %5901 = vmatmul.mubr.msk.f32.vlgmr.msra.gmra.mrb[46].mxu1 %vm780_vm3, %v3911_v44  ;;  %5906 = vmatmul.mubr.msk.f32.vlgmr.msra.gmra.mrb[44].mxu0 %vm780_vm3, %v3981_v45 }
0x16df   : > { %5910 = vmatprep.mubr.msk.f32.mxu1 %vm6562_vm0, %v6561_v0  ;;  %5915 = vmatprep.mubr.msk.f32.mxu0 %vm6562_vm0, %v6561_v0 }
0x16e2   : > { %v4208_v38 = vpop.f32.mrb[44].mxu1  ;;  %v4278_v52 = vpop.f32.mrb[42].mxu0 }
0x16e3   : > { %v5886_v53 = vpop.f32.mrb[45].mxu1  ;;  %v5897_v54 = vpop.f32.mrb[43].mxu0  ;;  %5909 = vmatpush3.msra.mxu1 %v4208_v38  ;;  %5914 = vmatpush3.msra.mxu0 %v4278_v52 }
0x16e4   : > { %6168 = vmatprep.subr.bf16.mxu1 %v6563_v1  ;;  %6174 = vmatprep.subr.bf16.mxu0 %v6563_v1  ;;  %v4794_v53 = vld [vmem:[#allocation10 + $0x20] sm:$0xff]  ;;  %v4795_v54 = vld [vmem:[#allocation10 + $0x28] sm:$0xff] }
0x17b1   : > { %v4365_v55 = vpop.f32.mrb[46].mxu1  ;;  %v4441_v56 = vpop.f32.mrb[44].mxu0 }
0x17b2   : > { %v5902_v57 = vpop.f32.mrb[47].mxu1  ;;  %v5907_v58 = vpop.f32.mrb[45].mxu0  ;;  %v4445_v59 = vsel %vm1365_vm5, %v4365_v55, -inf  ;;  %v4448_v19 = vsel %vm1365_vm5, %v4441_v56, -inf }
0x17b3   : > { %4446 = vmax.xlane.f32.xlu0 %v4445_v59  ;;  %4449 = vmax.xlane.f32.xlu1 %v4448_v19  ;;  %v4797_v57 = vld [vmem:[#allocation10 + $0x38] sm:$0xff]  ;;  %v5237_v59 = vld [vmem:[%s7515_s15 + $0x48] sm:$0xff]  ;;  %v5238_v19 = vld [vmem:[%s7515_s15 + $0x50] sm:$0xff] }
0x1840   : > { %v4447_v60 = vpop.xlane.xlu0 %4446  ;;  %v4450_v62 = vpop.xlane.xlu1 %4449 }
0x1841   : > { %v4451_v27 = vsub.f32 %v4365_v55, %v4447_v60  ;;  %v4452_v2 = vsub.f32 %v4441_v56, %v4450_v62  ;;  %v6181_v55 = vpack.c.bf16 %v4795_v54, %v4794_v53  ;;  %v4796_v56 = vld [vmem:[#allocation10 + $0x30] sm:$0xff]  ;;  %v5239_v62 = vld [vmem:[%s7515_s15 + $0x58] sm:$0xff] }
0x1842   : > { %v6184_v58 = vpack.c.bf16 %v4797_v57, %v4796_v56 }
0x1843   : > { %v4453_v3 = vmul.f32 1.442695, %v4451_v27  ;;  %v4455_v4 = vmul.f32 1.442695, %v4452_v2  ;;  %v6190_v27 = vpack.c.bf16 %v5239_v62, %v5238_v19  ;;  %v5240_v2 = vld [vmem:[%s7515_s15 + $0x60] sm:$0xff] }
0x1845   : > { %6326 = vpow2.f32 %v4453_v3  ;;  %v5241_v3 = vld [vmem:[%s7515_s15 + $0x68] sm:$0xff] }
0x1846   : > { %6328 = vpow2.f32 %v4455_v4  ;;  %v6193_v4 = vpack.c.bf16 %v5241_v3, %v5240_v2 }
0x184f   : > { %v6327_v5 = vpop.eup %6326 }
0x1850   : > { %v6329_v6 = vpop.eup %6328  ;;  %v4457_v61 = vsel %vm1365_vm5, %v6327_v5, 0.0 }
0x1851   : > { %4458 = vadd.xlane.f32.xlu0 %v4457_v61  ;;  %v4460_v8 = vsel %vm1365_vm5, %v6329_v6, 0.0 }
0x1852   : > { %4461 = vadd.xlane.f32.xlu1 %v4460_v8  ;;  %v4786_v8 = vrot.slane %v7272_v7, %v2666_v17  ;;  %v5234_v17 = vld [vmem:[%s7565_s14 + $0x1] ss:$0 sm:$0xff] }
0x18de   : > { %v4459_v9 = vpop.xlane.xlu0 %4458 }
0x18df   : > { %6330 = vrcp.f32 %v4459_v9  ;;  %v4462_v10 = vpop.xlane.xlu1 %4461 }
0x18e0   : > { %6332 = vrcp.f32 %v4462_v10 }
0x18e9   : > { %v6331_v21 = vpop.eup %6330 }
0x18ea   : > { %v6333_v13 = vpop.eup %6332  ;;  %v4464_v23 = vmul.f32 %v6331_v21, %v6327_v5 }
0x18eb   : > { %v4466_v28 = vmul.f32 %v6333_v13, %v6329_v6 }
0x18ec   : > { %5911 = vmatmul.mubr.msk.f32.vlgmr.msra.gmra.mrb[48].mxu1 %vm1365_vm5, %v4464_v23 }
0x18ed   : > { %5916 = vmatmul.mubr.msk.f32.vlgmr.msra.gmra.mrb[46].mxu0 %vm1365_vm5, %v4466_v28  ;;  %6170 = vmatpush3.bf16.msra.mxu1 %v6169_v22 }
0x18ee   : > { %6176 = vmatpush3.bf16.msra.mxu0 %v6175_v24  ;;  %6171 = vmatprep.subr.bf16.mxu1 %v6563_v1  ;;  %v5245_v24 = vld [vmem:[%s7566_s25 + $0x1] ss:$0 sm:$0xff] }
0x18ef   : > { %6177 = vmatprep.subr.bf16.mxu0 %v6563_v1  ;;  %5926 = vmatprep.mubr.msk.f32.mxu1 %vm6562_vm0, %v6561_v0 }
0x18f0   : > { %5937 = vmatprep.mubr.msk.f32.mxu0 %vm6562_vm0, %v6561_v0 }
0x18f1   : > { %6173 = vmatpush3.bf16.msra.mxu1 %v6172_v32 }
0x18f2   : > { %6179 = vmatpush3.bf16.msra.mxu0 %v6178_v33  ;;  %6180 = vmatprep.subr.bf16.mxu1 %v6563_v1 }
0x18f3   : > { %6186 = vmatprep.subr.bf16.mxu0 %v6563_v1 }
0x19bf   : > { %v4536_v34 = vpop.f32.mrb[48].mxu1 }
0x19c0   : > { %v4609_v35 = vpop.f32.mrb[46].mxu0  ;;  %v5912_v36 = vpop.f32.mrb[49].mxu1  ;;  %5927 = vmatmul.mubr.msk.f32.vlgmr.msra.gmra.mrb[50].mxu1 %vm780_vm3, %v4536_v34 }
0x19c1   : > { %v5917_v37 = vpop.f32.mrb[47].mxu0  ;;  %5938 = vmatmul.mubr.msk.f32.vlgmr.msra.gmra.mrb[48].mxu0 %vm780_vm3, %v4609_v35  ;;  %5948 = vmatprep.mubr.msk.f32.mxu1 %vm6562_vm0, %v6561_v0 }
0x19c2   : > { %5967 = vmatprep.mubr.msk.f32.mxu0 %vm6562_vm0, %v6561_v0  ;;  %6182 = vmatpush3.bf16.msra.mxu1 %v6181_v55 }
0x19c3   : > { %6183 = vmatprep.subr.bf16.mxu1 %v6563_v1 }
0x19c6   : > { %6185 = vmatpush3.bf16.msra.mxu1 %v6184_v58 }
0x1a93   : > { %v4682_v39 = vpop.f32.mrb[50].mxu1 }
0x1a94   : > { %v4759_v40 = vsel %vm780_vm3, %v4682_v39, 0.0  ;;  %v4755_v41 = vpop.f32.mrb[48].mxu0  ;;  %v5928_v42 = vpop.f32.mrb[51].mxu1 }
0x1a95   : > { %v4760_v44 = vsel %vm780_vm3, %v4755_v41, 0.0  ;;  %v5939_v45 = vpop.f32.mrb[49].mxu0  ;;  %v4987_v41 = vrot.slane %v7272_v7, %v2864_v63 }
0x1a96   : > { %v4761_v46 = vadd.f32 %v4760_v44, %v4759_v40  ;;  %v4992_v44 = vrot.slane %v7272_v7, %v2869_v29 }
0x1a98   : > { %v4768_v47 = vadd.f32 %v5232_v43, %v4761_v46 }
0x1a9a   : > { %v4769_v48 = vadd.f32 %v4768_v47, %v7295_v14  ;;  %v5236_v14 = vld [vmem:[%s7515_s15 + $0x40] sm:$0xff] }
0x1a9b   : > { %v6187_v60 = vpack.c.bf16 %v5237_v59, %v5236_v14 }
0x1a9c   : > { %v4770_v49 = vsel %vm780_vm3, %v4769_v48, 0.0 }
0x1a9d   : > { %4771 = vadd.xlane.f32.xlu0 %v4770_v49  ;;  %6188 = vmatpush3.bf16.msra.mxu0 %v6187_v60 }
0x1a9e   : > { %6189 = vmatprep.subr.bf16.mxu0 %v6563_v1 }
0x1aa1   : > { %6191 = vmatpush3.bf16.msra.mxu0 %v6190_v27 }
0x1aa2   : > { %6192 = vmatprep.subr.bf16.mxu0 %v6563_v1 }
0x1aa5   : > { %6194 = vmatpush3.bf16.msra.mxu0 %v6193_v4 }
0x1aa6   : > { %6195 = vmatprep.subr.bf16.mxu0 %v6563_v1  ;;  %v5242_v1 = vld [vmem:[%s7515_s15 + $0x70] sm:$0xff] }
0x1aa7   : > { %v6196_v21 = vpack.c.bf16 %v5243_v12, %v5242_v1 }
0x1aa9   : > { %6197 = vmatpush3.bf16.msra.mxu0 %v6196_v21 }
0x1b2a   : > { %v4772_v0 = vpop.xlane.xlu0 %4771 }
0x1b2b   : > { %v4773_v50 = vmul.f32 0.03125, %v4772_v0 }
0x1b2d   : > { %v4774_v51 = vsub.f32 %v4769_v48, %v4773_v50 }
0x1b2f   : > { %v4775_v38 = vmul.f32 %v4774_v51, %v4774_v51 }
0x1b31   : > { %v4776_v52 = vsel %vm780_vm3, %v4775_v38, 0.0 }
0x1b32   : > { %4777 = vadd.xlane.f32.xlu1 %v4776_v52 }
0x1bbf   : > { %v4778_v5 = vpop.xlane.xlu1 %4777 }
0x1bc0   : > { %v4779_v6 = vmul.f32 0.03125, %v4778_v5 }
0x1bc2   : > { %v4780_v61 = vadd.f32 1e-05, %v4779_v6 }
0x1bc4   : > { %6334 = vrsqrt.f32 %v4780_v61 }
0x1bce   : > { %v6335_v9 = vpop.eup %6334 }
0x1bcf   : > { %v4782_v10 = vmul.f32 %v6335_v9, %v4774_v51 }
0x1bd1   : > { %v4787_v16 = vmul.f32 %v4786_v8, %v4782_v10 }
0x1bd3   : > { %v4792_v20 = vadd.f32 %v4791_v15, %v4787_v16 }
0x1bd5   : > { %5949 = vmatmul.mubr.msk.f32.vlgmr.msra.gmra.mrb[52].mxu1 %vm780_vm3, %v4792_v20 }
0x1ca8   : > { %v4875_v22 = vpop.f32.mrb[52].mxu1 }
0x1ca9   : > { %v4876_v18 = vadd.f32 %v5234_v17, %v4875_v22  ;;  %v5950_v13 = vpop.f32.mrb[53].mxu1 }
0x1cab   : > { %v4879_v23 = vmax.f32 %v4876_v18, 0.0 }
0x1cad   : > { %5968 = vmatmul.mubr.msk.f32.vlgmr.msra.gmra.mrb[50].mxu0 %vm2774_vm6, %v4879_v23 }
0x1d80   : > { %v4966_v25 = vpop.f32.mrb[50].mxu0 }
0x1d81   : > { %v4967_v26 = vadd.f32 %v5245_v24, %v4966_v25  ;;  %v5969_v28 = vpop.f32.mrb[51].mxu0 }
0x1d83   : > { %v4970_v30 = vadd.f32 %v4967_v26, %v4792_v20 }
0x1d85   : > { %v4971_v31 = vsel %vm780_vm3, %v4970_v30, 0.0 }
0x1d86   : > { %4972 = vadd.xlane.f32.xlu0 %v4971_v31 }
0x1e13   : > { %v4973_v32 = vpop.xlane.xlu0 %4972 }
0x1e14   : > { %v4974_v33 = vmul.f32 0.03125, %v4973_v32 }
0x1e16   : > { %v4975_v34 = vsub.f32 %v4970_v30, %v4974_v33 }
0x1e18   : > { %v4976_v35 = vmul.f32 %v4975_v34, %v4975_v34 }
0x1e1a   : > { %v4977_v36 = vsel %vm780_vm3, %v4976_v35, 0.0 }
0x1e1b   : > { %4978 = vadd.xlane.f32.xlu1 %v4977_v36 }
0x1ea8   : > { %v4979_v37 = vpop.xlane.xlu1 %4978 }
0x1ea9   : > { %v4980_v39 = vmul.f32 0.03125, %v4979_v37 }
0x1eab   : > { %v4981_v40 = vadd.f32 1e-05, %v4980_v39 }
0x1ead   : > { %6336 = vrsqrt.f32 %v4981_v40 }
0x1eb7   : > { %v6337_v42 = vpop.eup %6336 }
0x1eb8   : > { %v4983_v43 = vmul.f32 %v6337_v42, %v4975_v34 }
0x1eba   : > { %v4988_v45 = vmul.f32 %v4987_v41, %v4983_v43 }
0x1ebc   : > { %v4993_v46 = vadd.f32 %v4992_v44, %v4988_v45 }
0x1ebe   : > { %4994 = vst.msk [vmem:[%s652_s2] sm:$0xff] %vm780_vm3, %v4993_v46 }
0x1ebf   : > { %6491 = shalt.err (!%p6488_p0)
}
0x1ec0   : > { %s6492_s19 = scalar_lea.hbm %s7457_s18, 128  ;;  %s6496_s23 = scalar_lea.hbm %s7569_s26, 256 }
0x1ec1   : > { %p6493_p10 = scmp.ne.s32.totalorder %s7457_s18, %s6492_s19  ;;  %p6497_p4 = scmp.lt.u32.totalorder %s7457_s18, %s7569_s26 }
0x1ec2   : > { %p6498_p12 = scmp.lt.u32.totalorder %s6496_s23, %s6492_s19  ;;  %p6500_p8 = scmp.lt.u32.totalorder %s6492_s19, %s7457_s18 }
0x1ec3   : > { %p6494_p2 = pnand %p6493_p10, %p7570_p11 }
0x1ec4   : > { %p6499_p7 = por %p6498_p12, %p6497_p4 }
0x1ec5   : > { %p6495_p3 = pneg %p6494_p2 }
0x1ec6   : > { %p6501_p13 = por %p6500_p8, %p6499_p7 }
0x1ec8   : > { %p6502_p1 = pnand %p6501_p13, %p6495_p3 }
0x1eca   : > { %6505 = shalt.err (!%p6502_p1)
}
0x1ecb   : > { %6218 = dma.vmem_to_hbm [thread:$0]  (%p7570_p11), %s7459_s20, 128, %s7457_s18, %s4996_s24  }
0x1ecc PF: > { %s7571_s22 = sld [smem:[#allocation19_spill]]  ;;  %s7572_s30 = sld [smem:[#allocation16_spill]] }
0x1ecd   : > { %s7573_s21 = sld [smem:[#allocation23_spill]] }
0x1ed2   : > { %p6250_p6 = scmp.ge.s32.totalorder %s7571_s22, 2  ;;  %s5021_s0 = sand.u32 1, %s7572_s30  }
0x1ed3   : > { %p7574_p9 = scmp.ne.s32.totalorder %s7573_s21, 0  ;;  %s5022_s28 = scalar_lea.sflag [#allocation4], %s5021_s0 }
0x1ed5   : > { %p6237_p5 = pnand %p6250_p6, %p7574_p9 }
0x1ed7   : > { %6535 = dma.done.wait (!%p6237_p5), %s5022_s28, 128  }
0x1ed8   : > { %6537 = vsyncadd (!%p6237_p5), %s5022_s28, 4294967168  ;;  %s7575_s30 = sld [smem:[#allocation20_spill]]  ;;  %s7576_s27 = sld [smem:[#allocation17_spill]] }
0x1ed9   : > { %s7577_s28 = sld [smem:[#allocation18_spill]]  ;;  %s7578_s29 = sld [smem:[#allocation21_spill]] }
0x1ede   : > { %p31_p0 = scmp.ge.s32.totalorder %s7575_s30, 4  }
0x1ee0   :  { %33 = sbr.rel (!%p31_p0) target bundleno = 14 (0xe), region = 163 }
0x1ee7   :  { %5027 = vsyncpa [#allocation3], 1 }
0x1ee8   :  { %5029 = vsyncpa [#allocation3 + $0x1], 1 }
0x1ee9   :  { %5030 = vsyncpa [#allocation6], 1 }
0x1eea   :  { %5031 = vsyncpa [#allocation9], 1 }
0x1eeb   :  { %5032 = vsyncpa [#allocation4], 1 }
0x1eec   :  { %5034 = vsyncpa [#allocation4 + $0x1], 1 }

</bundles_post_ra>
